<compile_context>
chip_gen: v6e
topology: v6e:2x2x1
jax: 0.10.0
libtpu: 0.0.40
codegen_flags: <defaults>
</compile_context>

<pallas_src>
import functools
import math

import jax
import jax.numpy as jnp
from jax.experimental import pallas as pl
from jax.experimental.pallas import tpu as pltpu

INPUT_SIZE = 784
HIDDEN_SIZE = 1024
NUM_CLASSES = 10

C_PAD = 128        # class dim padded to one full vreg lane group
NEG_BIG = -1e30    # padded-class bias (f32) -> exp underflows to exactly 0


def _round_up(x, m):
    return (x + m - 1) // m * m


def _mlp_softmax_kernel(x_ref, w1_ref, b1_ref, w2_ref, b2_ref, o_ref):
    """fc1 -> ReLU -> fc2 -> softmax for one batch tile, fully in VMEM.

    x_ref:  (TB, 784)            f32  (cast to bf16 here, at the MXU boundary)
    w1_ref: (784, HIDDEN_SIZE)   bf16
    b1_ref: (1, HIDDEN_SIZE)     f32
    w2_ref: (HIDDEN_SIZE, C_PAD) bf16 (zero cols 10..127)
    b2_ref: (1, C_PAD)           f32  (-1e30 in padded cols)
    o_ref:  (TB, C_PAD)          f32
    """
    # fc1: bf16 operands on the MXU, f32 accumulation; bias/ReLU in f32 (VPU)
    x = x_ref[...].astype(jnp.bfloat16)
    h = jnp.dot(x, w1_ref[...], preferred_element_type=jnp.float32)
    h = jnp.maximum(h + b1_ref[...], 0.0)

    # fc2: hidden activations cast to bf16 for the MXU, accumulate in f32
    logits = jnp.dot(h.astype(jnp.bfloat16), w2_ref[...],
                     preferred_element_type=jnp.float32) + b2_ref[...]

    # numerically stable softmax over 128 lanes; padded classes contribute 0
    m = jnp.max(logits, axis=-1, keepdims=True)
    e = jnp.exp(logits - m)
    denom = jnp.sum(e, axis=-1, keepdims=True)
    r = pl.reciprocal(denom, approx=True)   # EUP
    r = r * (2.0 - denom * r)               # one Newton step -> near-exact sums
    o_ref[...] = (e * r).astype(o_ref.dtype)


def prepare_params(w1, b1, w2, b2):
    """One-time weight prep (cast / class-dim pad). Keep OUT of the per-call path."""
    assert w1.shape == (INPUT_SIZE, HIDDEN_SIZE)
    assert b1.shape == (1, HIDDEN_SIZE)
    assert w2.shape == (HIDDEN_SIZE, NUM_CLASSES)
    assert b2.shape == (1, NUM_CLASSES)
    w1_p = w1.astype(jnp.bfloat16)
    b1_p = b1.astype(jnp.float32)
    w2_p = jnp.pad(w2, ((0, 0), (0, C_PAD - NUM_CLASSES))).astype(jnp.bfloat16)
    b2_p = jnp.pad(b2.astype(jnp.float32),
                   ((0, 0), (0, C_PAD - NUM_CLASSES)),
                   constant_values=NEG_BIG)
    return w1_p, b1_p, w2_p, b2_p


@functools.partial(jax.jit, static_argnames=("tile_b",))
def classifier_forward(x, w1_p, b1_p, w2_p, b2_p, *, tile_b=512):
    """Pallas-backed forward pass of Classifier (activation='relu').

    Expects pre-prepared params from `prepare_params`.
    """
    B, in_sz = x.shape
    assert in_sz == INPUT_SIZE

    # Batch tile: multiple of 16 (bf16 sublane packing), <= tile_b, and capped
    # so there are >= 2 grid steps whenever possible (v7x has 2 TensorCores).
    b16 = _round_up(B, 16)
    tb = min(tile_b, b16)
    if b16 >= 32:
        tb = min(tb, _round_up((b16 + 1) // 2, 16))
    tb = _round_up(tb, 16)
    b_pad = _round_up(b16, tb)
    grid = (b_pad // tb,)

    # Row padding only; x stays f32 with K = 784 (no wrapper pad/cast pass).
    x_p = jnp.pad(x, ((0, b_pad - B), (0, 0)))

    # Constant-index weight/bias blocks: single buffer, fetched once.
    const = dict(pipeline_mode=pl.Buffered(1))

    cost = pl.CostEstimate(
        flops=2 * b_pad * (INPUT_SIZE * HIDDEN_SIZE + HIDDEN_SIZE * C_PAD),
        transcendentals=b_pad * C_PAD,
        bytes_accessed=(b_pad * INPUT_SIZE * 4
                        + INPUT_SIZE * HIDDEN_SIZE * 2
                        + HIDDEN_SIZE * C_PAD * 2
                        + (HIDDEN_SIZE + C_PAD) * 4
                        + b_pad * C_PAD * 4),
    )

    out = pl.pallas_call(
        _mlp_softmax_kernel,
        out_shape=jax.ShapeDtypeStruct((b_pad, C_PAD), jnp.float32),
        grid_spec=pltpu.PrefetchScalarGridSpec(
            num_scalar_prefetch=0,
            grid=grid,
            in_specs=[
                # batch-tiled activations (last dim 784 == full array dim)
                pl.BlockSpec((tb, INPUT_SIZE), lambda i: (i, 0)),
                # weights/biases: full arrays, resident for every grid step
                pl.BlockSpec((INPUT_SIZE, HIDDEN_SIZE), lambda i: (0, 0), **const),
                pl.BlockSpec((1, HIDDEN_SIZE), lambda i: (0, 0), **const),
                pl.BlockSpec((HIDDEN_SIZE, C_PAD), lambda i: (0, 0), **const),
                pl.BlockSpec((1, C_PAD), lambda i: (0, 0), **const),
            ],
            out_specs=pl.BlockSpec((tb, C_PAD), lambda i: (i, 0)),
        ),
        compiler_params=pltpu.CompilerParams(
            dimension_semantics=("parallel",),
        ),
        cost_estimate=cost,
    )(x_p, w1_p, b1_p, w2_p, b2_p)

    # Drop batch and class padding.
    return out[:B, :NUM_CLASSES]


def init_params(key):
    """Deterministic init matching nn.Linear's U(-1/sqrt(fan_in), 1/sqrt(fan_in))."""
    k1, k2, k3, k4 = jax.random.split(key, 4)
    bound1 = 1.0 / math.sqrt(INPUT_SIZE)
    bound2 = 1.0 / math.sqrt(HIDDEN_SIZE)
    # stored as (in, out); equivalent to PyTorch weight.T
    w1 = jax.random.uniform(k1, (INPUT_SIZE, HIDDEN_SIZE), jnp.float32, -bound1, bound1)
    b1 = jax.random.uniform(k2, (1, HIDDEN_SIZE), jnp.float32, -bound1, bound1)
    w2 = jax.random.uniform(k3, (HIDDEN_SIZE, NUM_CLASSES), jnp.float32, -bound2, bound2)
    b2 = jax.random.uniform(k4, (1, NUM_CLASSES), jnp.float32, -bound2, bound2)
    return w1, b1, w2, b2


def reference_forward(x, w1, b1, w2, b2):
    h = jnp.maximum(x @ w1 + b1, 0.0)
    return jax.nn.softmax(h @ w2 + b2, axis=1)


if __name__ == "__main__":
    key = jax.random.PRNGKey(0)
    kx, kp = jax.random.split(key)

    B = 16  # small test batch (wrapper handles any B via row padding)
    x = jax.random.normal(kx, (B, INPUT_SIZE), jnp.float32)
    w1, b1, w2, b2 = init_params(kp)

    # One-time weight prep (cast / class padding), outside the jitted call path.
    w1_p, b1_p, w2_p, b2_p = prepare_params(w1, b1, w2, b2)

    out = classifier_forward(x, w1_p, b1_p, w2_p, b2_p)
    out = jax.block_until_ready(out)

    ref = reference_forward(x, w1, b1, w2, b2)
    assert out.shape == (B, NUM_CLASSES)
    # Newton-refined reciprocal -> row sums accurate to ~f32; bf16 MXU operands
    # -> loosened element tolerances vs the f32 reference.
    assert jnp.allclose(jnp.sum(out, axis=1), 1.0, atol=1e-3)
    assert jnp.allclose(out, ref, atol=5e-3, rtol=2e-2)

    print("KERNEL_OK")
</pallas_src>

<mosaic_0001>
module attributes {stable_mosaic.version = 11 : i64} {
  func.func @_mlp_softmax_kernel(%arg0: i32, %arg1: memref<16x784xf32, #tpu.memory_space<vmem>>, %arg2: memref<784x1024xbf16, #tpu.memory_space<vmem>>, %arg3: memref<1x1024xf32, #tpu.memory_space<vmem>>, %arg4: memref<1024x128xbf16, #tpu.memory_space<vmem>>, %arg5: memref<1x128xf32, #tpu.memory_space<vmem>>, %arg6: memref<16x128xf32, #tpu.memory_space<vmem>>) attributes {dimension_semantics = [#tpu.dimension_semantics<parallel>], iteration_bounds = array<i64: 1>, scalar_prefetch = 0 : i64, scratch_operands = 0 : i64, tpu.core_type = #tpu.core_type<tc>, window_params = [{transform_indices = @transform_0, window_bounds = array<i64: 16, 784>}, {pipeline_mode = #tpu.pipeline_mode<synchronous>, transform_indices = @transform_1, window_bounds = array<i64: 784, 1024>}, {pipeline_mode = #tpu.pipeline_mode<synchronous>, transform_indices = @transform_2, window_bounds = array<i64: 1, 1024>}, {pipeline_mode = #tpu.pipeline_mode<synchronous>, transform_indices = @transform_3, window_bounds = array<i64: 1024, 128>}, {pipeline_mode = #tpu.pipeline_mode<synchronous>, transform_indices = @transform_4, window_bounds = array<i64: 1, 128>}, {transform_indices = @transform_5, window_bounds = array<i64: 16, 128>}]} {
    %c0 = arith.constant 0 : index
    %c0_0 = arith.constant 0 : index
    %0 = vector.load %arg1[%c0, %c0_0] : memref<16x784xf32, #tpu.memory_space<vmem>>, vector<16x784xf32>
    %1 = arith.truncf %0 : vector<16x784xf32> to vector<16x784xbf16>
    %c0_1 = arith.constant 0 : index
    %c0_2 = arith.constant 0 : index
    %2 = vector.load %arg2[%c0_1, %c0_2] : memref<784x1024xbf16, #tpu.memory_space<vmem>>, vector<784x1024xbf16>
    %cst = arith.constant dense<0.000000e+00> : vector<16x1024xf32>
    %3 = tpu.matmul %1, %2, %cst {dimension_numbers = #tpu.dot_dimension_numbers<[1], [0], [0], [1], [0, 0, 1, 1], [], []>} : vector<16x784xbf16>, vector<784x1024xbf16>, vector<16x1024xf32> -> vector<16x1024xf32>
    %c0_3 = arith.constant 0 : index
    %c0_4 = arith.constant 0 : index
    %4 = vector.load %arg3[%c0_3, %c0_4] : memref<1x1024xf32, #tpu.memory_space<vmem>>, vector<1x1024xf32>
    %5 = vector.broadcast %4 : vector<1x1024xf32> to vector<16x1024xf32>
    %6 = arith.addf %3, %5 : vector<16x1024xf32>
    %cst_5 = arith.constant 0.000000e+00 : f32
    %7 = vector.broadcast %cst_5 : f32 to vector<16x1024xf32>
    %8 = arith.maximumf %6, %7 : vector<16x1024xf32>
    %9 = arith.truncf %8 : vector<16x1024xf32> to vector<16x1024xbf16>
    %c0_6 = arith.constant 0 : index
    %c0_7 = arith.constant 0 : index
    %10 = vector.load %arg4[%c0_6, %c0_7] : memref<1024x128xbf16, #tpu.memory_space<vmem>>, vector<1024x128xbf16>
    %cst_8 = arith.constant dense<0.000000e+00> : vector<16x128xf32>
    %11 = tpu.matmul %9, %10, %cst_8 {dimension_numbers = #tpu.dot_dimension_numbers<[1], [0], [0], [1], [0, 0, 1, 1], [], []>} : vector<16x1024xbf16>, vector<1024x128xbf16>, vector<16x128xf32> -> vector<16x128xf32>
    %c0_9 = arith.constant 0 : index
    %c0_10 = arith.constant 0 : index
    %12 = vector.load %arg5[%c0_9, %c0_10] : memref<1x128xf32, #tpu.memory_space<vmem>>, vector<1x128xf32>
    %13 = vector.broadcast %12 : vector<1x128xf32> to vector<16x128xf32>
    %14 = arith.addf %11, %13 : vector<16x128xf32>
    %cst_11 = arith.constant dense<0xFF800000> : vector<16xf32>
    %15 = vector.multi_reduction <maximumf>, %14, %cst_11 [1] : vector<16x128xf32> to vector<16xf32>
    %16 = vector.shape_cast %15 : vector<16xf32> to vector<16x1xf32>
    %17 = vector.broadcast %16 : vector<16x1xf32> to vector<16x128xf32>
    %18 = arith.subf %14, %17 : vector<16x128xf32>
    %19 = math.exp %18 : vector<16x128xf32>
    %cst_12 = arith.constant dense<0.000000e+00> : vector<16xf32>
    %20 = vector.multi_reduction <add>, %19, %cst_12 [1] : vector<16x128xf32> to vector<16xf32>
    %21 = vector.shape_cast %20 : vector<16xf32> to vector<16x1xf32>
    %22 = tpu.reciprocal %21 {approx = true} : vector<16x1xf32> -> vector<16x1xf32>
    %23 = arith.mulf %21, %22 : vector<16x1xf32>
    %cst_13 = arith.constant 2.000000e+00 : f32
    %24 = vector.broadcast %cst_13 : f32 to vector<16x1xf32>
    %25 = arith.subf %24, %23 : vector<16x1xf32>
    %26 = arith.mulf %22, %25 : vector<16x1xf32>
    %27 = vector.broadcast %26 : vector<16x1xf32> to vector<16x128xf32>
    %28 = arith.mulf %19, %27 : vector<16x128xf32>
    %c0_14 = arith.constant 0 : index
    %c0_15 = arith.constant 0 : index
    %29 = vector.load %arg6[%c0_14, %c0_15] : memref<16x128xf32, #tpu.memory_space<vmem>>, vector<16x128xf32>
    tpu.vector_store %arg6[%c0_14, %c0_15], %28 {strides = array<i32>} : memref<16x128xf32, #tpu.memory_space<vmem>>, vector<16x128xf32>,
    return
  }
  func.func @transform_0(%arg0: i32) -> (i32, i32) {
    %c0_i32 = arith.constant 0 : i32
    %c0_i32_0 = arith.constant 0 : i32
    return %arg0, %c0_i32 : i32, i32
  }
  func.func @transform_1(%arg0: i32) -> (i32, i32) {
    %c0_i32 = arith.constant 0 : i32
    %c0_i32_0 = arith.constant 0 : i32
    %c0_i32_1 = arith.constant 0 : i32
    return %c0_i32, %c0_i32_0 : i32, i32
  }
  func.func @transform_2(%arg0: i32) -> (i32, i32) {
    %c0_i32 = arith.constant 0 : i32
    %c0_i32_0 = arith.constant 0 : i32
    %c0_i32_1 = arith.constant 0 : i32
    return %c0_i32, %c0_i32_0 : i32, i32
  }
  func.func @transform_3(%arg0: i32) -> (i32, i32) {
    %c0_i32 = arith.constant 0 : i32
    %c0_i32_0 = arith.constant 0 : i32
    %c0_i32_1 = arith.constant 0 : i32
    return %c0_i32, %c0_i32_0 : i32, i32
  }
  func.func @transform_4(%arg0: i32) -> (i32, i32) {
    %c0_i32 = arith.constant 0 : i32
    %c0_i32_0 = arith.constant 0 : i32
    %c0_i32_1 = arith.constant 0 : i32
    return %c0_i32, %c0_i32_0 : i32, i32
  }
  func.func @transform_5(%arg0: i32) -> (i32, i32) {
    %c0_i32 = arith.constant 0 : i32
    %c0_i32_0 = arith.constant 0 : i32
    return %arg0, %c0_i32 : i32, i32
  }
}

</mosaic_0001>

<bundles_post_ra>
// kernel: classifier_forward.1
= control target key start
LH: loop header
LB: loop body
LE: loop exit
PB: predicated region body
PF: predicated region fallthrough
CT: control target
= control target key end

     0   :  { %10 = vsyncpa [#allocation3], 0  ;;  %s4908_s0 = inlined_call_operand.hbm [shape: f32[16,784], index: 0, kind: input, shape index: {}]   ;;  %s4909_s1 = inlined_call_operand.hbm [shape: bf16[784,1024], index: 1, kind: input, shape index: {}]   ;;  %s4910_s2 = inlined_call_operand.hbm [shape: f32[1,1024], index: 2, kind: input, shape index: {}]   ;;  %s4911_s3 = inlined_call_operand.hbm [shape: bf16[1024,128], index: 3, kind: input, shape index: {}]   ;;  %s4912_s4 = inlined_call_operand.hbm [shape: f32[1,128], index: 4, kind: input, shape index: {}]   ;;  %s4913_s5 = inlined_call_operand.hbm [shape: f32[16,128], index: 5, kind: output, shape index: {}]  }
   0x1   :  { %11 = vsyncpa [#allocation6], 0 }
   0x2   :  { %12 = vsyncpa [#allocation9], 0 }
   0x3   :  { %13 = vsyncpa [#allocation4], 0  ;;  %s4709_s18 = smov [#allocation5]  }
   0x4   :  { %s31_s19 = sshll.u32 %s4709_s18, 4  ;;  %s32_s19 = int_to_ptr.vmem [resolvable:$true] %s31_s19 }
   0x5   :  { %s4589_s20 = scalar_lea.vmem %s32_s19, 50176  ;;  %p4594_p1 = scmp.lt.s32.totalorder %s32_s19, %s32_s19 }
   0x6   :  { %p4590_p0 = scmp.ne.s32.totalorder %s32_s19, %s4589_s20  ;;  %p4595_p2 = scmp.lt.s32.totalorder %s4589_s20, %s4589_s20 }
   0x8   :  { %p4596_p3 = por %p4595_p2, %p4594_p1 }
   0xa   :  { %p4597_p4 = pnand %p4596_p3, %p4590_p0 }
   0xc   :  { %4600 = shalt.err (!%p4597_p4)
}
   0xd   :  { %s4710_s21 = smov 512   ;;  %s4711_s22 = smov 32  }
   0xe   :  { %37 = dma.hbm_to_vmem [thread:$0]  %s4909_s1, 50176, %s32_s19, [#allocation6], %s4710_s21, %s4710_s21, %s4711_s22  }
   0xf   :  { %s4712_s25 = smov [#allocation8]  }
  0x10   :  { %s53_s26 = sshll.u32 %s4712_s25, 4  ;;  %s54_s26 = int_to_ptr.vmem [resolvable:$true] %s53_s26 }
  0x11   :  { %s4609_s27 = scalar_lea.vmem %s54_s26, 8192  ;;  %p4614_p6 = scmp.lt.s32.totalorder %s54_s26, %s54_s26 }
  0x12   :  { %p4610_p5 = scmp.ne.s32.totalorder %s54_s26, %s4609_s27  ;;  %p4615_p7 = scmp.lt.s32.totalorder %s4609_s27, %s4609_s27 }
  0x14   :  { %p4616_p8 = por %p4615_p7, %p4614_p6 }
  0x16   :  { %p4617_p9 = pnand %p4616_p8, %p4610_p5 }
  0x18   :  { %4620 = shalt.err (!%p4617_p9)
}
  0x19   :  { %s4713_s28 = smov 64   ;;  %s4714_s29 = smov 4  }
  0x1a   :  { %59 = dma.hbm_to_vmem [thread:$0]  %s4911_s3, 8192, %s54_s26, [#allocation9], %s4713_s28, %s4713_s28, %s4714_s29  }
  0x1b   :  { %s4715_s7 = smov [#allocation2]  }
  0x1c   :  { %s19_s8 = sshll.u32 %s4715_s7, 4  ;;  %s20_s8 = int_to_ptr.vmem [resolvable:$true] %s19_s8 }
  0x1d   :  { %s4629_s1 = scalar_lea.vmem %s20_s8, 1792  ;;  %p4634_p11 = scmp.lt.s32.totalorder %s20_s8, %s20_s8 }
  0x1e   :  { %p4630_p10 = scmp.ne.s32.totalorder %s20_s8, %s4629_s1  ;;  %p4635_p12 = scmp.lt.s32.totalorder %s4629_s1, %s4629_s1 }
  0x20   :  { %p4636_p13 = por %p4635_p12, %p4634_p11 }
  0x22   :  { %p4637_p0 = pnand %p4636_p13, %p4630_p10 }
  0x24   :  { %4640 = shalt.err (!%p4637_p0)
}
  0x25   :  { %s4716_s9 = smov 896   ;;  %s4717_s10 = smov 56  }
  0x26   :  { %25 = dma.hbm_to_vmem [thread:$0]  %s4908_s0, 1792, %s20_s8, [#allocation3], %s4716_s9, %s4716_s9, %s4717_s10  }
  0x27   :  { %s4718_s13 = smov [#allocation7]   ;;  %s4719_s3 = smov [#allocation10]  }
  0x28   :  { %s44_s14 = sshll.u32 %s4718_s13, 4  ;;  %s66_s15 = sshll.u32 %s4719_s3, 4  ;;  %s45_s14 = int_to_ptr.vmem [resolvable:$true] %s44_s14  ;;  %s67_s15 = int_to_ptr.vmem [resolvable:$true] %s66_s15 }
  0x29   :  { %s4649_s16 = scalar_lea.vmem %s45_s14, 128  ;;  %p4654_p2 = scmp.lt.s32.totalorder %s45_s14, %s45_s14 }
  0x2a   :  { %p4650_p1 = scmp.ne.s32.totalorder %s45_s14, %s4649_s16  ;;  %p4655_p3 = scmp.lt.s32.totalorder %s4649_s16, %s4649_s16 }
  0x2c   :  { %p4656_p4 = por %p4655_p3, %p4654_p2 }
  0x2e   :  { %p4657_p5 = pnand %p4656_p4, %p4650_p1 }
  0x30   :  { %4660 = shalt.err (!%p4657_p5)
}
  0x31   :  { %47 = dma.hbm_to_vmem [thread:$0]  %s4910_s2, 128, %s45_s14, [#allocation6]  }
  0x32   :  { %s4669_s19 = scalar_lea.vmem %s67_s15, 16  ;;  %s4673_s0 = scalar_lea.vmem %s67_s15, 32 }
  0x33   :  { %p4670_p6 = scmp.ne.s32.totalorder %s67_s15, %s4669_s19  ;;  %p4674_p7 = scmp.lt.s32.totalorder %s67_s15, %s67_s15 }
  0x34   :  { %p4675_p8 = scmp.lt.s32.totalorder %s4673_s0, %s4669_s19 }
  0x36   :  { %p4676_p9 = por %p4675_p8, %p4674_p7 }
  0x38   :  { %p4677_p10 = pnand %p4676_p9, %p4670_p6 }
  0x3a   :  { %4680 = shalt.err (!%p4677_p10)
}
  0x3b   :  { %69 = dma.hbm_to_vmem [thread:$0]  %s4912_s4, 16, %s67_s15, [#allocation9]  }
  0x3c   :  { %4701 = dma.done.wait [#allocation3], 1792  }
  0x3d   :  { %4702 = vsyncadd [#allocation3], 4294965504 }
  0x3e   :  { %4703 = dma.done.wait [#allocation6], 50304  }
  0x3f   :  { %4704 = vsyncadd [#allocation6], 4294916992 }
  0x40   :  { %4705 = dma.done.wait [#allocation9], 8208  }
  0x41   :  { %4706 = vsyncadd [#allocation9], 4294959088  ;;  %v163_v0 = vld [vmem:[#allocation5 + $0x1c0] sm:$0xff]  ;;  %v87_v54 = vld [vmem:[#allocation2 + $0x8] sm:$0xff]  ;;  %vm2501_vm0 = vcmask 130048   ;;  %s4721_s2 = smov [#allocation11]  }
  0x42   :  { %v167_v1 = vld [vmem:[#allocation5 + $0x1e0] sm:$0xff]  ;;  %v94_v55 = vld [vmem:[#allocation2 + $0x40] sm:$0xff]  ;;  %v89_v59 = vld [vmem:[#allocation2 + $0x18] sm:$0xff]  ;;  %s3931_s4 = sshll.u32 %s4721_s2, 4  ;;  %s3932_s4 = int_to_ptr.vmem [resolvable:$true] %s3931_s4 }
  0x43   :  { %v291_v2 = vld [vmem:[#allocation5 + $0x5c0] sm:$0xff]  ;;  %v4002_v3 = vcombine.high %v163_v0, %v167_v1  ;;  %v4001_v5 = vcombine.low %v163_v0, %v167_v1  ;;  %v4769_v58 = vpack.c.bf16 %v94_v55, %v87_v54  ;;  %s4681_s22 = scalar_lea.vmem %s3932_s4, 256  ;;  %p4686_p12 = scmp.lt.s32.totalorder %s3932_s4, %s3932_s4 }
  0x44   :  { %v295_v4 = vld [vmem:[#allocation5 + $0x5e0] sm:$0xff]  ;;  %p4682_p11 = scmp.ne.s32.totalorder %s3932_s4, %s4681_s22  ;;  %p4687_p13 = scmp.lt.s32.totalorder %s4681_s22, %s4681_s22 }
  0x45   :  { %v155_v6 = vld [vmem:[#allocation5 + $0x180] sm:$0xff]  ;;  %v4130_v8 = vcombine.high %v291_v2, %v295_v4  ;;  %v4129_v9 = vcombine.low %v291_v2, %v295_v4  ;;  %2505 = vmatprep.subr.bf16.mxu0 %v4002_v3  ;;  %2537 = vmatprep.mubr.bf16.mxu0 %v4769_v58 }
  0x46   :  { %v159_v7 = vld [vmem:[#allocation5 + $0x1a0] sm:$0xff]  ;;  %2506 = vmatpush1.bf16.msra.mxu0 %v4001_v5  ;;  %p4688_p0 = por %p4687_p13, %p4686_p12 }
  0x47   :  { %v3994_v10 = vcombine.high %v155_v6, %v159_v7  ;;  %v283_v11 = vld [vmem:[#allocation5 + $0x580] sm:$0xff]  ;;  %2548 = vmatprep.subr.bf16.mxu1 %v4130_v8  ;;  %v3993_v18 = vcombine.low %v155_v6, %v159_v7 }
  0x48   :  { %v287_v12 = vld [vmem:[#allocation5 + $0x5a0] sm:$0xff]  ;;  %2549 = vmatpush1.bf16.msra.mxu1 %v4129_v9  ;;  %p4689_p1 = pnand %p4688_p0, %p4682_p11 }
  0x49   :  { %v147_v13 = vld [vmem:[#allocation5 + $0x140] sm:$0xff]  ;;  %v4122_v14 = vcombine.high %v283_v11, %v287_v12  ;;  %2507 = vmatprep.subr.bf16.mxu0 %v3994_v10  ;;  %v4121_v19 = vcombine.low %v283_v11, %v287_v12 }
  0x4a   :  { %v151_v15 = vld [vmem:[#allocation5 + $0x160] sm:$0xff]  ;;  %2508 = vmatpush1.bf16.msra.mxu0 %v3993_v18 }
  0x4b   :  { %v275_v16 = vld [vmem:[#allocation5 + $0x540] sm:$0xff]  ;;  %v3986_v20 = vcombine.high %v147_v13, %v151_v15  ;;  %2550 = vmatprep.subr.bf16.mxu1 %v4122_v14  ;;  %v3985_v26 = vcombine.low %v147_v13, %v151_v15 }
  0x4c   :  { %v279_v17 = vld [vmem:[#allocation5 + $0x560] sm:$0xff]  ;;  %2551 = vmatpush1.bf16.msra.mxu1 %v4121_v19 }
  0x4d   :  { %v4114_v21 = vcombine.high %v275_v16, %v279_v17  ;;  %v139_v22 = vld [vmem:[#allocation5 + $0x100] sm:$0xff]  ;;  %2509 = vmatprep.subr.bf16.mxu0 %v3986_v20  ;;  %v4113_v27 = vcombine.low %v275_v16, %v279_v17 }
  0x4e   :  { %v143_v23 = vld [vmem:[#allocation5 + $0x120] sm:$0xff]  ;;  %2510 = vmatpush1.bf16.msra.mxu0 %v3985_v26 }
  0x4f   :  { %v267_v24 = vld [vmem:[#allocation5 + $0x500] sm:$0xff]  ;;  %v3978_v28 = vcombine.high %v139_v22, %v143_v23  ;;  %2552 = vmatprep.subr.bf16.mxu1 %v4114_v21  ;;  %v3977_v34 = vcombine.low %v139_v22, %v143_v23 }
  0x50   :  { %v271_v25 = vld [vmem:[#allocation5 + $0x520] sm:$0xff]  ;;  %2553 = vmatpush1.bf16.msra.mxu1 %v4113_v27 }
  0x51   :  { %v4106_v29 = vcombine.high %v267_v24, %v271_v25  ;;  %v131_v30 = vld [vmem:[#allocation5 + $0xc0] sm:$0xff]  ;;  %2511 = vmatprep.subr.bf16.mxu0 %v3978_v28  ;;  %v4105_v35 = vcombine.low %v267_v24, %v271_v25 }
  0x52   :  { %v135_v31 = vld [vmem:[#allocation5 + $0xe0] sm:$0xff]  ;;  %2512 = vmatpush1.bf16.msra.mxu0 %v3977_v34 }
  0x53   :  { %v259_v32 = vld [vmem:[#allocation5 + $0x4c0] sm:$0xff]  ;;  %v3970_v36 = vcombine.high %v131_v30, %v135_v31  ;;  %2554 = vmatprep.subr.bf16.mxu1 %v4106_v29  ;;  %v3969_v42 = vcombine.low %v131_v30, %v135_v31 }
  0x54   :  { %v263_v33 = vld [vmem:[#allocation5 + $0x4e0] sm:$0xff]  ;;  %2555 = vmatpush1.bf16.msra.mxu1 %v4105_v35 }
  0x55   :  { %v4098_v37 = vcombine.high %v259_v32, %v263_v33  ;;  %v123_v38 = vld [vmem:[#allocation5 + $0x80] sm:$0xff]  ;;  %2513 = vmatprep.subr.bf16.mxu0 %v3970_v36  ;;  %v4097_v43 = vcombine.low %v259_v32, %v263_v33 }
  0x56   :  { %v127_v39 = vld [vmem:[#allocation5 + $0xa0] sm:$0xff]  ;;  %2514 = vmatpush1.bf16.msra.mxu0 %v3969_v42 }
  0x57   :  { %v251_v40 = vld [vmem:[#allocation5 + $0x480] sm:$0xff]  ;;  %v3962_v44 = vcombine.high %v123_v38, %v127_v39  ;;  %2556 = vmatprep.subr.bf16.mxu1 %v4098_v37  ;;  %v3961_v50 = vcombine.low %v123_v38, %v127_v39 }
  0x58   :  { %v255_v41 = vld [vmem:[#allocation5 + $0x4a0] sm:$0xff]  ;;  %2557 = vmatpush1.bf16.msra.mxu1 %v4097_v43 }
  0x59   :  { %v4090_v45 = vcombine.high %v251_v40, %v255_v41  ;;  %v115_v46 = vld [vmem:[#allocation5 + $0x40] sm:$0xff]  ;;  %2515 = vmatprep.subr.bf16.mxu0 %v3962_v44  ;;  %v4089_v51 = vcombine.low %v251_v40, %v255_v41 }
  0x5a   :  { %v119_v47 = vld [vmem:[#allocation5 + $0x60] sm:$0xff]  ;;  %2516 = vmatpush1.bf16.msra.mxu0 %v3961_v50 }
  0x5b   :  { %v243_v48 = vld [vmem:[#allocation5 + $0x440] sm:$0xff]  ;;  %v3954_v52 = vcombine.high %v115_v46, %v119_v47  ;;  %2558 = vmatprep.subr.bf16.mxu1 %v4090_v45  ;;  %v3953_v0 = vcombine.low %v115_v46, %v119_v47 }
  0x5c   :  { %v247_v49 = vld [vmem:[#allocation5 + $0x460] sm:$0xff]  ;;  %2559 = vmatpush1.bf16.msra.mxu1 %v4089_v51 }
  0x5d   :  { %v107_v53 = vld [vmem:[#allocation5] sm:$0xff]  ;;  %v4082_v56 = vcombine.high %v243_v48, %v247_v49  ;;  %2517 = vmatprep.subr.bf16.mxu0 %v3954_v52  ;;  %v4081_v1 = vcombine.low %v243_v48, %v247_v49 }
  0x5e   :  { %v111_v57 = vld [vmem:[#allocation5 + $0x20] sm:$0xff]  ;;  %2518 = vmatpush1.bf16.msra.mxu0 %v3953_v0 }
  0x5f   :  { %v96_v60 = vld [vmem:[#allocation2 + $0x50] sm:$0xff]  ;;  %v3946_v2 = vcombine.high %v107_v53, %v111_v57  ;;  %2560 = vmatprep.subr.bf16.mxu1 %v4082_v56  ;;  %v3945_v8 = vcombine.low %v107_v53, %v111_v57 }
  0x60   :  { %v235_v61 = vld [vmem:[#allocation5 + $0x400] sm:$0xff]  ;;  %v4771_v63 = vpack.c.bf16 %v96_v60, %v89_v59  ;;  %2561 = vmatpush1.bf16.msra.mxu1 %v4081_v1 }
  0x61   :  { %v239_v62 = vld [vmem:[#allocation5 + $0x420] sm:$0xff]  ;;  %2519 = vmatprep.subr.bf16.mxu0 %v3946_v2 }
  0x62   :  { %v4074_v3 = vcombine.high %v235_v61, %v239_v62  ;;  %v227_v4 = vld [vmem:[#allocation5 + $0x3c0] sm:$0xff]  ;;  %2580 = vmatprep.mubr.bf16.mxu1 %v4771_v63  ;;  %v4073_v9 = vcombine.low %v235_v61, %v239_v62  ;;  %2520 = vmatpush1.bf16.msra.mxu0 %v3945_v8 }
  0x63   :  { %v231_v5 = vld [vmem:[#allocation5 + $0x3e0] sm:$0xff] }
  0x64   :  { %v355_v6 = vld [vmem:[#allocation5 + $0x7c0] sm:$0xff]  ;;  %v4066_v10 = vcombine.high %v227_v4, %v231_v5  ;;  %2562 = vmatprep.subr.bf16.mxu1 %v4074_v3  ;;  %v4065_v16 = vcombine.low %v227_v4, %v231_v5 }
  0x65   :  { %v359_v7 = vld [vmem:[#allocation5 + $0x7e0] sm:$0xff]  ;;  %2563 = vmatpush1.bf16.msra.mxu1 %v4073_v9 }
  0x66   :  { %v4194_v11 = vcombine.high %v355_v6, %v359_v7  ;;  %v219_v12 = vld [vmem:[#allocation5 + $0x380] sm:$0xff]  ;;  %2521 = vmatprep.subr.bf16.mxu0 %v4066_v10  ;;  %v4193_v17 = vcombine.low %v355_v6, %v359_v7 }
  0x67   :  { %v223_v13 = vld [vmem:[#allocation5 + $0x3a0] sm:$0xff]  ;;  %2522 = vmatpush2.bf16.msra.mxu0 %v4065_v16 }
  0x68   :  { %v347_v14 = vld [vmem:[#allocation5 + $0x780] sm:$0xff]  ;;  %v4058_v18 = vcombine.high %v219_v12, %v223_v13  ;;  %2564 = vmatprep.subr.bf16.mxu1 %v4194_v11  ;;  %v4057_v24 = vcombine.low %v219_v12, %v223_v13  ;;  %v86_v11 = vld [vmem:[#allocation2] sm:$0xff]  ;;  %v93_v12 = vld [vmem:[#allocation2 + $0x38] sm:$0xff] }
  0x69   :  { %v351_v15 = vld [vmem:[#allocation5 + $0x7a0] sm:$0xff]  ;;  %2565 = vmatpush2.bf16.msra.mxu1 %v4193_v17 }
  0x6a   :  { %v4186_v19 = vcombine.high %v347_v14, %v351_v15  ;;  %v211_v20 = vld [vmem:[#allocation5 + $0x340] sm:$0xff]  ;;  %2523 = vmatprep.subr.bf16.mxu0 %v4058_v18  ;;  %v4185_v25 = vcombine.low %v347_v14, %v351_v15  ;;  %v95_v15 = vld [vmem:[#allocation2 + $0x48] sm:$0xff] }
  0x6b   :  { %v215_v21 = vld [vmem:[#allocation5 + $0x360] sm:$0xff]  ;;  %2524 = vmatpush2.bf16.msra.mxu0 %v4057_v24 }
  0x6c   :  { %v339_v22 = vld [vmem:[#allocation5 + $0x740] sm:$0xff]  ;;  %v4050_v26 = vcombine.high %v211_v20, %v215_v21  ;;  %2566 = vmatprep.subr.bf16.mxu1 %v4186_v19  ;;  %v4049_v32 = vcombine.low %v211_v20, %v215_v21  ;;  %v4775_v20 = vpack.c.bf16 %v93_v12, %v86_v11  ;;  %v164_v21 = vld [vmem:[#allocation5 + $0x1c8] sm:$0xff] }
  0x6d   :  { %v343_v23 = vld [vmem:[#allocation5 + $0x760] sm:$0xff]  ;;  %2567 = vmatpush2.bf16.msra.mxu1 %v4185_v25  ;;  %v91_v25 = vld [vmem:[#allocation2 + $0x28] sm:$0xff] }
  0x6e   :  { %v4178_v27 = vcombine.high %v339_v22, %v343_v23  ;;  %v203_v28 = vld [vmem:[#allocation5 + $0x300] sm:$0xff]  ;;  %2525 = vmatprep.subr.bf16.mxu0 %v4050_v26  ;;  %v4177_v33 = vcombine.low %v339_v22, %v343_v23  ;;  %v168_v22 = vld [vmem:[#allocation5 + $0x1e8] sm:$0xff]  ;;  %v98_v26 = vld [vmem:[#allocation2 + $0x60] sm:$0xff] }
  0x6f   :  { %v207_v29 = vld [vmem:[#allocation5 + $0x320] sm:$0xff]  ;;  %2526 = vmatpush2.bf16.msra.mxu0 %v4049_v32  ;;  %v4780_v32 = vpack.c.bf16 %v98_v26, %v91_v25  ;;  %v108_v26 = vld [vmem:[#allocation5 + $0x8] sm:$0xff] }
  0x70   :  { %v331_v30 = vld [vmem:[#allocation5 + $0x700] sm:$0xff]  ;;  %v4042_v34 = vcombine.high %v203_v28, %v207_v29  ;;  %2568 = vmatprep.subr.bf16.mxu1 %v4178_v27  ;;  %v4041_v40 = vcombine.low %v203_v28, %v207_v29  ;;  %v4004_v29 = vcombine.high %v164_v21, %v168_v22 }
  0x71   :  { %v335_v31 = vld [vmem:[#allocation5 + $0x720] sm:$0xff]  ;;  %2569 = vmatpush2.bf16.msra.mxu1 %v4177_v33 }
  0x72   :  { %v4170_v35 = vcombine.high %v331_v30, %v335_v31  ;;  %v195_v36 = vld [vmem:[#allocation5 + $0x2c0] sm:$0xff]  ;;  %2527 = vmatprep.subr.bf16.mxu0 %v4042_v34  ;;  %v4169_v41 = vcombine.low %v331_v30, %v335_v31 }
  0x73   :  { %v199_v37 = vld [vmem:[#allocation5 + $0x2e0] sm:$0xff]  ;;  %2528 = vmatpush2.bf16.msra.mxu0 %v4041_v40  ;;  %v4720_v40 = vmov 0  }
  0x74   :  { %v323_v38 = vld [vmem:[#allocation5 + $0x6c0] sm:$0xff]  ;;  %v4034_v42 = vcombine.high %v195_v36, %v199_v37  ;;  %2570 = vmatprep.subr.bf16.mxu1 %v4170_v35  ;;  %v4033_v48 = vcombine.low %v195_v36, %v199_v37  ;;  %v99_v35 = vld [vmem:[#allocation2 + $0x68] sm:$0xff]  ;;  %v156_v37 = vld [vmem:[#allocation5 + $0x188] sm:$0xff] }
  0x75   :  { %v327_v39 = vld [vmem:[#allocation5 + $0x6e0] sm:$0xff]  ;;  %2571 = vmatpush2.bf16.msra.mxu1 %v4169_v41 }
  0x76   :  { %v4162_v43 = vcombine.high %v323_v38, %v327_v39  ;;  %v187_v44 = vld [vmem:[#allocation5 + $0x280] sm:$0xff]  ;;  %2529 = vmatprep.subr.bf16.mxu0 %v4034_v42  ;;  %v4161_v49 = vcombine.low %v323_v38, %v327_v39  ;;  %v160_v38 = vld [vmem:[#allocation5 + $0x1a8] sm:$0xff] }
  0x77   :  { %v191_v45 = vld [vmem:[#allocation5 + $0x2a0] sm:$0xff]  ;;  %2530 = vmatpush2.bf16.msra.mxu0 %v4033_v48 }
  0x78   :  { %v315_v46 = vld [vmem:[#allocation5 + $0x680] sm:$0xff]  ;;  %v4026_v50 = vcombine.high %v187_v44, %v191_v45  ;;  %2572 = vmatprep.subr.bf16.mxu1 %v4162_v43  ;;  %v4025_v56 = vcombine.low %v187_v44, %v191_v45  ;;  %v4003_v44 = vcombine.low %v164_v21, %v168_v22 }
  0x79   :  { %v319_v47 = vld [vmem:[#allocation5 + $0x6a0] sm:$0xff]  ;;  %2573 = vmatpush2.bf16.msra.mxu1 %v4161_v49  ;;  %v3996_v49 = vcombine.high %v156_v37, %v160_v38 }
  0x7a   :  { %v4154_v51 = vcombine.high %v315_v46, %v319_v47  ;;  %v179_v52 = vld [vmem:[#allocation5 + $0x240] sm:$0xff]  ;;  %2531 = vmatprep.subr.bf16.mxu0 %v4026_v50  ;;  %v4153_v57 = vcombine.low %v315_v46, %v319_v47  ;;  %v148_v46 = vld [vmem:[#allocation5 + $0x148] sm:$0xff] }
  0x7b   :  { %v183_v53 = vld [vmem:[#allocation5 + $0x260] sm:$0xff]  ;;  %2532 = vmatpush2.bf16.msra.mxu0 %v4025_v56  ;;  %v152_v47 = vld [vmem:[#allocation5 + $0x168] sm:$0xff] }
  0x7c   :  { %v307_v54 = vld [vmem:[#allocation5 + $0x640] sm:$0xff]  ;;  %v4018_v59 = vcombine.high %v179_v52, %v183_v53  ;;  %2574 = vmatprep.subr.bf16.mxu1 %v4154_v51  ;;  %v4017_v2 = vcombine.low %v179_v52, %v183_v53  ;;  %v3995_v52 = vcombine.low %v156_v37, %v160_v38 }
  0x7d   :  { %v311_v55 = vld [vmem:[#allocation5 + $0x660] sm:$0xff]  ;;  %2575 = vmatpush2.bf16.msra.mxu1 %v4153_v57  ;;  %v3988_v57 = vcombine.high %v148_v46, %v152_v47 }
  0x7e   :  { %v4146_v60 = vcombine.high %v307_v54, %v311_v55  ;;  %v171_v61 = vld [vmem:[#allocation5 + $0x200] sm:$0xff]  ;;  %2533 = vmatprep.subr.bf16.mxu0 %v4018_v59  ;;  %v4145_v3 = vcombine.low %v307_v54, %v311_v55  ;;  %v140_v54 = vld [vmem:[#allocation5 + $0x108] sm:$0xff] }
  0x7f   :  { %v175_v62 = vld [vmem:[#allocation5 + $0x220] sm:$0xff]  ;;  %2534 = vmatpush2.bf16.msra.mxu0 %v4017_v2  ;;  %v144_v55 = vld [vmem:[#allocation5 + $0x128] sm:$0xff] }
  0x80   :  { %v299_v0 = vld [vmem:[#allocation5 + $0x600] sm:$0xff]  ;;  %v4010_v4 = vcombine.high %v171_v61, %v175_v62  ;;  %2576 = vmatprep.subr.bf16.mxu1 %v4146_v60  ;;  %v4009_v10 = vcombine.low %v171_v61, %v175_v62  ;;  %v3987_v61 = vcombine.low %v148_v46, %v152_v47  ;;  %v224_v46 = vld [vmem:[#allocation5 + $0x3a8] sm:$0xff] }
  0x81   :  { %v303_v1 = vld [vmem:[#allocation5 + $0x620] sm:$0xff]  ;;  %2577 = vmatpush2.bf16.msra.mxu1 %v4145_v3  ;;  %v3980_v3 = vcombine.high %v140_v54, %v144_v55 }
  0x82   :  { %v4138_v5 = vcombine.high %v299_v0, %v303_v1  ;;  %v419_v6 = vld [vmem:[#allocation5 + $0x9c0] sm:$0xff]  ;;  %2535 = vmatprep.subr.bf16.mxu0 %v4010_v4  ;;  %v4137_v13 = vcombine.low %v299_v0, %v303_v1  ;;  %v132_v0 = vld [vmem:[#allocation5 + $0xc8] sm:$0xff] }
  0x83   :  { %v423_v7 = vld [vmem:[#allocation5 + $0x9e0] sm:$0xff]  ;;  %2536 = vmatpush2.bf16.msra.mxu0 %v4009_v10  ;;  %v136_v1 = vld [vmem:[#allocation5 + $0xe8] sm:$0xff] }
  0x84   :  { %v491_v8 = vld [vmem:[#allocation5 + $0xc00] sm:$0xff]  ;;  %v4258_v16 = vcombine.high %v419_v6, %v423_v7  ;;  %2578 = vmatprep.subr.bf16.mxu1 %v4138_v5  ;;  %v4257_v24 = vcombine.low %v419_v6, %v423_v7  ;;  %v3979_v6 = vcombine.low %v140_v54, %v144_v55  ;;  %v3972_v11 = vcombine.high %v132_v0, %v136_v1  ;;  %v216_v54 = vld [vmem:[#allocation5 + $0x368] sm:$0xff] }
  0x85   :  { %v495_v9 = vld [vmem:[#allocation5 + $0xc20] sm:$0xff]  ;;  %2579 = vmatpush2.bf16.msra.mxu1 %v4137_v13 }
  0x86   :  { %v88_v14 = vld [vmem:[#allocation2 + $0x10] sm:$0xff]  ;;  %v4330_v17 = vcombine.high %v491_v8, %v495_v9  ;;  %2591 = vmatprep.subr.bf16.mxu0 %v4258_v16  ;;  %v4329_v27 = vcombine.low %v491_v8, %v495_v9  ;;  %2538 = vmatmul.mubr.bf16.vlgmr.msra.gmra.mxu0 %v4775_v20  ;;  %v124_v8 = vld [vmem:[#allocation5 + $0x88] sm:$0xff] }
  0x87   :  { %v411_v18 = vld [vmem:[#allocation5 + $0x980] sm:$0xff]  ;;  %v4777_v23 = vpack.c.bf16 %v95_v15, %v88_v14  ;;  %2592 = vmatpush1.bf16.msra.mxu0 %v4257_v24  ;;  %2623 = vmatprep.mubr.bf16.mxu0 %v4780_v32  ;;  %v128_v9 = vld [vmem:[#allocation5 + $0xa8] sm:$0xff]  ;;  %v3971_v14 = vcombine.low %v132_v0, %v136_v1 }
  0x88   :  { %v415_v19 = vld [vmem:[#allocation5 + $0x9a0] sm:$0xff]  ;;  %2648 = vmatprep.subr.bf16.mxu1 %v4330_v17  ;;  %v116_v16 = vld [vmem:[#allocation5 + $0x48] sm:$0xff]  ;;  %v3963_v24 = vcombine.low %v124_v8, %v128_v9 }
  0x89   :  { %v4250_v28 = vcombine.high %v411_v18, %v415_v19  ;;  %v403_v30 = vld [vmem:[#allocation5 + $0x940] sm:$0xff]  ;;  %2581 = vmatmul.mubr.bf16.vlgmr.msra.gmra.mxu1 %v4777_v23  ;;  %v4249_v33 = vcombine.low %v411_v18, %v415_v19  ;;  %v120_v17 = vld [vmem:[#allocation5 + $0x68] sm:$0xff]  ;;  %v3964_v19 = vcombine.high %v124_v8, %v128_v9 }
  0x8a   :  { %v407_v31 = vld [vmem:[#allocation5 + $0x960] sm:$0xff]  ;;  %2649 = vmatpush1.bf16.msra.mxu1 %v4329_v27  ;;  %2666 = vmatprep.mubr.bf16.mxu1 %v4720_v40  ;;  %v112_v27 = vld [vmem:[#allocation5 + $0x28] sm:$0xff] }
  0x8b   :  { %v92_v34 = vld [vmem:[#allocation2 + $0x30] sm:$0xff]  ;;  %2593 = vmatprep.subr.bf16.mxu0 %v4250_v28  ;;  %v4242_v36 = vcombine.high %v403_v30, %v407_v31  ;;  %2677 = vmatprep.subr.bf16.mxu1 %v4004_v29  ;;  %v4241_v42 = vcombine.low %v403_v30, %v407_v31  ;;  %v3956_v29 = vcombine.high %v116_v16, %v120_v17  ;;  %v208_v0 = vld [vmem:[#allocation5 + $0x328] sm:$0xff] }
  0x8c   :  { %v395_v39 = vld [vmem:[#allocation5 + $0x900] sm:$0xff]  ;;  %2594 = vmatpush1.bf16.msra.mxu0 %v4249_v33  ;;  %v4785_v43 = vpack.c.bf16 %v99_v35, %v92_v34  ;;  %v3955_v33 = vcombine.low %v116_v16, %v120_v17  ;;  %v228_v35 = vld [vmem:[#allocation5 + $0x3c8] sm:$0xff]  ;;  %v3948_v38 = vcombine.high %v108_v26, %v112_v27 }
  0x8d   :  { %v399_v41 = vld [vmem:[#allocation5 + $0x920] sm:$0xff]  ;;  %2595 = vmatprep.subr.bf16.mxu0 %v4242_v36  ;;  %v232_v36 = vld [vmem:[#allocation5 + $0x3e8] sm:$0xff] }
  0x8e   :  { %v4234_v45 = vcombine.high %v395_v39, %v399_v41  ;;  %v387_v48 = vld [vmem:[#allocation5 + $0x8c0] sm:$0xff]  ;;  %v4233_v51 = vcombine.low %v395_v39, %v399_v41  ;;  %v200_v8 = vld [vmem:[#allocation5 + $0x2e8] sm:$0xff] }
  0x8f   :  { %v391_v50 = vld [vmem:[#allocation5 + $0x8e0] sm:$0xff]  ;;  %v192_v16 = vld [vmem:[#allocation5 + $0x2a8] sm:$0xff] }
  0x90   :  { %2596 = vmatpush1.bf16.msra.mxu0 %v4241_v42  ;;  %v4226_v53 = vcombine.high %v387_v48, %v391_v50  ;;  %v379_v56 = vld [vmem:[#allocation5 + $0x880] sm:$0xff]  ;;  %v4225_v60 = vcombine.low %v387_v48, %v391_v50  ;;  %v3947_v42 = vcombine.low %v108_v26, %v112_v27  ;;  %v4068_v48 = vcombine.high %v228_v35, %v232_v36  ;;  %v184_v26 = vld [vmem:[#allocation5 + $0x268] sm:$0xff] }
  0x91   :  { %4337 = vmatmul.mubr.msk.bf16.vlgmr.msra.gmra.mxu1 %vm2501_vm0, %v4785_v43  ;;  %2597 = vmatprep.subr.bf16.mxu0 %v4234_v45  ;;  %v383_v59 = vld [vmem:[#allocation5 + $0x8a0] sm:$0xff]  ;;  %v220_v45 = vld [vmem:[#allocation5 + $0x388] sm:$0xff] }
  0x92   :  { %2678 = vmatpush1.bf16.msra.mxu1 %v4003_v44  ;;  %2709 = vmatprep.mubr.bf16.mxu1 %v4769_v58  ;;  %v4218_v62 = vcombine.high %v379_v56, %v383_v59  ;;  %v371_v2 = vld [vmem:[#allocation5 + $0x840] sm:$0xff]  ;;  %v4217_v5 = vcombine.low %v379_v56, %v383_v59  ;;  %v4060_v56 = vcombine.high %v220_v45, %v224_v46  ;;  %v292_v27 = vld [vmem:[#allocation5 + $0x5c8] sm:$0xff] }
  0x93   :  { %2679 = vmatprep.subr.bf16.mxu1 %v3996_v49  ;;  %v375_v4 = vld [vmem:[#allocation5 + $0x860] sm:$0xff] }
  0x94   :  { %2598 = vmatpush1.bf16.msra.mxu0 %v4233_v51  ;;  %v4210_v7 = vcombine.high %v371_v2, %v375_v4  ;;  %v363_v10 = vld [vmem:[#allocation5 + $0x800] sm:$0xff]  ;;  %v4209_v13 = vcombine.low %v371_v2, %v375_v4  ;;  %v4067_v51 = vcombine.low %v228_v35, %v232_v36  ;;  %v172_v36 = vld [vmem:[#allocation5 + $0x208] sm:$0xff] }
  0x95   :  { %2599 = vmatprep.subr.bf16.mxu0 %v4226_v53  ;;  %v367_v12 = vld [vmem:[#allocation5 + $0x820] sm:$0xff]  ;;  %v212_v53 = vld [vmem:[#allocation5 + $0x348] sm:$0xff] }
  0x96   :  { %2680 = vmatpush1.bf16.msra.mxu1 %v3995_v52  ;;  %v4202_v15 = vcombine.high %v363_v10, %v367_v12  ;;  %v483_v18 = vld [vmem:[#allocation5 + $0xbc0] sm:$0xff]  ;;  %v4201_v22 = vcombine.low %v363_v10, %v367_v12  ;;  %v4052_v2 = vcombine.high %v212_v53, %v216_v54 }
  0x97   :  { %2681 = vmatprep.subr.bf16.mxu1 %v3988_v57  ;;  %v487_v21 = vld [vmem:[#allocation5 + $0xbe0] sm:$0xff] }
  0x98   :  { %2600 = vmatpush1.bf16.msra.mxu0 %v4225_v60  ;;  %v4322_v25 = vcombine.high %v483_v18, %v487_v21  ;;  %v475_v28 = vld [vmem:[#allocation5 + $0xb80] sm:$0xff]  ;;  %v4321_v31 = vcombine.low %v483_v18, %v487_v21  ;;  %v4059_v60 = vcombine.low %v220_v45, %v224_v46 }
  0x99   :  { %2601 = vmatprep.subr.bf16.mxu0 %v4218_v62  ;;  %v479_v30 = vld [vmem:[#allocation5 + $0xba0] sm:$0xff]  ;;  %v204_v62 = vld [vmem:[#allocation5 + $0x308] sm:$0xff] }
  0x9a   :  { %2682 = vmatpush1.bf16.msra.mxu1 %v3987_v61  ;;  %v4314_v34 = vcombine.high %v475_v28, %v479_v30  ;;  %v467_v37 = vld [vmem:[#allocation5 + $0xb40] sm:$0xff]  ;;  %v4313_v41 = vcombine.low %v475_v28, %v479_v30  ;;  %v4044_v10 = vcombine.high %v204_v62, %v208_v0  ;;  %v97_v30 = vld [vmem:[#allocation2 + $0x58] sm:$0xff] }
  0x9b   :  { %2683 = vmatprep.subr.bf16.mxu1 %v3980_v3  ;;  %v471_v39 = vld [vmem:[#allocation5 + $0xb60] sm:$0xff] }
  0x9c   :  { %2602 = vmatpush1.bf16.msra.mxu0 %v4217_v5  ;;  %v4306_v44 = vcombine.high %v467_v37, %v471_v39  ;;  %v459_v47 = vld [vmem:[#allocation5 + $0xb00] sm:$0xff]  ;;  %v4305_v50 = vcombine.low %v467_v37, %v471_v39  ;;  %v4051_v5 = vcombine.low %v212_v53, %v216_v54  ;;  %v176_v37 = vld [vmem:[#allocation5 + $0x228] sm:$0xff] }
  0x9d   :  { %2603 = vmatprep.subr.bf16.mxu0 %v4210_v7  ;;  %v463_v49 = vld [vmem:[#allocation5 + $0xb20] sm:$0xff]  ;;  %v196_v7 = vld [vmem:[#allocation5 + $0x2c8] sm:$0xff]  ;;  %v4011_v53 = vcombine.low %v172_v36, %v176_v37 }
  0x9e   :  { %2684 = vmatpush1.bf16.msra.mxu1 %v3979_v6  ;;  %v4298_v52 = vcombine.high %v459_v47, %v463_v49  ;;  %v451_v55 = vld [vmem:[#allocation5 + $0xac0] sm:$0xff]  ;;  %v4297_v59 = vcombine.low %v459_v47, %v463_v49  ;;  %v4036_v18 = vcombine.high %v196_v7, %v200_v8  ;;  %v420_v47 = vld [vmem:[#allocation5 + $0x9c8] sm:$0xff]  ;;  %v4012_v49 = vcombine.high %v172_v36, %v176_v37 }
  0x9f   :  { %2685 = vmatprep.subr.bf16.mxu1 %v3972_v11  ;;  %v455_v57 = vld [vmem:[#allocation5 + $0xae0] sm:$0xff]  ;;  %v356_v37 = vld [vmem:[#allocation5 + $0x7c8] sm:$0xff] }
  0xa0   :  { %2604 = vmatpush1.bf16.msra.mxu0 %v4209_v13  ;;  %v4290_v61 = vcombine.high %v451_v55, %v455_v57  ;;  %v443_v1 = vld [vmem:[#allocation5 + $0xa80] sm:$0xff]  ;;  %v4289_v4 = vcombine.low %v451_v55, %v455_v57  ;;  %v4043_v13 = vcombine.low %v204_v62, %v208_v0  ;;  %v268_v55 = vld [vmem:[#allocation5 + $0x508] sm:$0xff] }
  0xa1   :  { %2605 = vmatprep.subr.bf16.mxu0 %v4202_v15  ;;  %v447_v3 = vld [vmem:[#allocation5 + $0xaa0] sm:$0xff]  ;;  %v188_v15 = vld [vmem:[#allocation5 + $0x288] sm:$0xff] }
  0xa2   :  { %2686 = vmatpush1.bf16.msra.mxu1 %v3971_v14  ;;  %v4282_v6 = vcombine.high %v443_v1, %v447_v3  ;;  %v435_v9 = vld [vmem:[#allocation5 + $0xa40] sm:$0xff]  ;;  %v4281_v12 = vcombine.low %v443_v1, %v447_v3  ;;  %v4028_v28 = vcombine.high %v188_v15, %v192_v16  ;;  %v272_v57 = vld [vmem:[#allocation5 + $0x528] sm:$0xff] }
  0xa3   :  { %2687 = vmatprep.subr.bf16.mxu1 %v3964_v19  ;;  %v439_v11 = vld [vmem:[#allocation5 + $0xa60] sm:$0xff]  ;;  %v4108_v0 = vcombine.high %v268_v55, %v272_v57  ;;  %v264_v3 = vld [vmem:[#allocation5 + $0x4e8] sm:$0xff] }
  0xa4   :  { %2606 = vmatpush1.bf16.msra.mxu0 %v4201_v22  ;;  %v4274_v14 = vcombine.high %v435_v9, %v439_v11  ;;  %v427_v17 = vld [vmem:[#allocation5 + $0xa00] sm:$0xff]  ;;  %v4273_v21 = vcombine.low %v435_v9, %v439_v11  ;;  %v4035_v22 = vcombine.low %v196_v7, %v200_v8  ;;  %v256_v11 = vld [vmem:[#allocation5 + $0x4a8] sm:$0xff] }
  0xa5   :  { %2607 = vmatprep.subr.bf16.mxu0 %v4322_v25  ;;  %v431_v19 = vld [vmem:[#allocation5 + $0xa20] sm:$0xff]  ;;  %v180_v25 = vld [vmem:[#allocation5 + $0x248] sm:$0xff] }
  0xa6   :  { %2688 = vmatpush1.bf16.msra.mxu1 %v3963_v24  ;;  %v4266_v24 = vcombine.high %v427_v17, %v431_v19  ;;  %v4020_v39 = vcombine.high %v180_v25, %v184_v26  ;;  %v4019_v45 = vcombine.low %v180_v25, %v184_v26 }
  0xa7   :  { %2689 = vmatprep.subr.bf16.mxu1 %v3956_v29  ;;  %v90_v29 = vld [vmem:[#allocation2 + $0x20] sm:$0xff] }
  0xa8   :  { %2608 = vmatpush2.bf16.msra.mxu0 %v4321_v31  ;;  %v296_v31 = vld [vmem:[#allocation5 + $0x5e8] sm:$0xff] }
  0xa9   :  { %2609 = vmatprep.subr.bf16.mxu0 %v4314_v34  ;;  %v4027_v34 = vcombine.low %v188_v15, %v192_v16  ;;  %v4132_v35 = vcombine.high %v292_v27, %v296_v31 }
  0xaa   :  { %2690 = vmatpush1.bf16.msra.mxu1 %v3955_v33  ;;  %v4265_v33 = vcombine.low %v427_v17, %v431_v19  ;;  %v248_v19 = vld [vmem:[#allocation5 + $0x468] sm:$0xff] }
  0xab   :  { %2691 = vmatprep.subr.bf16.mxu1 %v3948_v38  ;;  %v284_v38 = vld [vmem:[#allocation5 + $0x588] sm:$0xff] }
  0xac   :  { %2610 = vmatpush2.bf16.msra.mxu0 %v4313_v41  ;;  %v288_v41 = vld [vmem:[#allocation5 + $0x5a8] sm:$0xff] }
  0xad   :  { %2611 = vmatprep.subr.bf16.mxu0 %v4306_v44  ;;  %v4131_v44 = vcombine.low %v292_v27, %v296_v31  ;;  %v4124_v46 = vcombine.high %v284_v38, %v288_v41  ;;  %v384_v31 = vld [vmem:[#allocation5 + $0x8a8] sm:$0xff] }
  0xae   :  { %2692 = vmatpush1.bf16.msra.mxu1 %v3947_v42  ;;  %v4790_v42 = vpack.c.bf16 %v97_v30, %v90_v29  ;;  %v240_v29 = vld [vmem:[#allocation5 + $0x428] sm:$0xff] }
  0xaf   :  { %2693 = vmatprep.subr.bf16.mxu1 %v4068_v48  ;;  %v424_v48 = vld [vmem:[#allocation5 + $0x9e8] sm:$0xff] }
  0xb0   :  { %2612 = vmatpush2.bf16.msra.mxu0 %v4305_v50  ;;  %v276_v50 = vld [vmem:[#allocation5 + $0x548] sm:$0xff]  ;;  %v4259_v62 = vcombine.low %v420_v47, %v424_v48 }
  0xb1   :  { %2613 = vmatprep.subr.bf16.mxu0 %v4298_v52  ;;  %v4123_v52 = vcombine.low %v284_v38, %v288_v41  ;;  %v380_v30 = vld [vmem:[#allocation5 + $0x888] sm:$0xff] }
  0xb2   :  { %2694 = vmatpush2.bf16.msra.mxu1 %v4067_v51  ;;  %v280_v51 = vld [vmem:[#allocation5 + $0x568] sm:$0xff]  ;;  %v4220_v36 = vcombine.high %v380_v30, %v384_v31 }
  0xb3   :  { %2695 = vmatprep.subr.bf16.mxu1 %v4060_v56  ;;  %v4116_v54 = vcombine.high %v276_v50, %v280_v51  ;;  %v4260_v56 = vcombine.high %v420_v47, %v424_v48  ;;  %v360_v38 = vld [vmem:[#allocation5 + $0x7e8] sm:$0xff] }
  0xb4   :  { %2614 = vmatpush2.bf16.msra.mxu0 %v4297_v59  ;;  %v412_v59 = vld [vmem:[#allocation5 + $0x988] sm:$0xff] }
  0xb5   :  { %2615 = vmatprep.subr.bf16.mxu0 %v4290_v61  ;;  %v4115_v61 = vcombine.low %v276_v50, %v280_v51  ;;  %v376_v41 = vld [vmem:[#allocation5 + $0x868] sm:$0xff] }
  0xb6   :  { %2696 = vmatpush2.bf16.msra.mxu1 %v4059_v60  ;;  %v416_v60 = vld [vmem:[#allocation5 + $0x9a8] sm:$0xff] }
  0xb7   :  { %2697 = vmatprep.subr.bf16.mxu1 %v4052_v2  ;;  %v4252_v1 = vcombine.high %v412_v59, %v416_v60  ;;  %v260_v2 = vld [vmem:[#allocation5 + $0x4c8] sm:$0xff]  ;;  %v4251_v7 = vcombine.low %v412_v59, %v416_v60 }
  0xb8   :  { %2616 = vmatpush2.bf16.msra.mxu0 %v4289_v4  ;;  %v404_v4 = vld [vmem:[#allocation5 + $0x948] sm:$0xff]  ;;  %v4100_v8 = vcombine.high %v260_v2, %v264_v3 }
  0xb9   :  { %2617 = vmatprep.subr.bf16.mxu0 %v4282_v6  ;;  %v4107_v6 = vcombine.low %v268_v55, %v272_v57  ;;  %v348_v48 = vld [vmem:[#allocation5 + $0x788] sm:$0xff] }
  0xba   :  { %2698 = vmatpush2.bf16.msra.mxu1 %v4051_v5  ;;  %v408_v5 = vld [vmem:[#allocation5 + $0x968] sm:$0xff] }
  0xbb   :  { %2699 = vmatprep.subr.bf16.mxu1 %v4044_v10  ;;  %v4244_v9 = vcombine.high %v404_v4, %v408_v5  ;;  %v252_v10 = vld [vmem:[#allocation5 + $0x488] sm:$0xff]  ;;  %v4243_v15 = vcombine.low %v404_v4, %v408_v5 }
  0xbc   :  { %2618 = vmatpush2.bf16.msra.mxu0 %v4281_v12  ;;  %v396_v12 = vld [vmem:[#allocation5 + $0x908] sm:$0xff]  ;;  %v4092_v16 = vcombine.high %v252_v10, %v256_v11 }
  0xbd   :  { %2619 = vmatprep.subr.bf16.mxu0 %v4274_v14  ;;  %v4099_v14 = vcombine.low %v260_v2, %v264_v3  ;;  %v364_v50 = vld [vmem:[#allocation5 + $0x808] sm:$0xff] }
  0xbe   :  { %2700 = vmatpush2.bf16.msra.mxu1 %v4043_v13  ;;  %v400_v13 = vld [vmem:[#allocation5 + $0x928] sm:$0xff] }
  0xbf   :  { %2701 = vmatprep.subr.bf16.mxu1 %v4036_v18  ;;  %v4236_v17 = vcombine.high %v396_v12, %v400_v13  ;;  %v244_v18 = vld [vmem:[#allocation5 + $0x448] sm:$0xff]  ;;  %v4235_v25 = vcombine.low %v396_v12, %v400_v13 }
  0xc0   :  { %2620 = vmatpush2.bf16.msra.mxu0 %v4273_v21  ;;  %v388_v21 = vld [vmem:[#allocation5 + $0x8c8] sm:$0xff]  ;;  %v4084_v26 = vcombine.high %v244_v18, %v248_v19 }
  0xc1   :  { %2621 = vmatprep.subr.bf16.mxu0 %v4266_v24  ;;  %v4091_v24 = vcombine.low %v252_v10, %v256_v11  ;;  %v368_v51 = vld [vmem:[#allocation5 + $0x828] sm:$0xff] }
  0xc2   :  { %2702 = vmatpush2.bf16.msra.mxu1 %v4035_v22  ;;  %v392_v22 = vld [vmem:[#allocation5 + $0x8e8] sm:$0xff]  ;;  %v4204_v55 = vcombine.high %v364_v50, %v368_v51 }
  0xc3   :  { %2703 = vmatprep.subr.bf16.mxu1 %v4028_v28  ;;  %v4228_v27 = vcombine.high %v388_v21, %v392_v22  ;;  %v236_v28 = vld [vmem:[#allocation5 + $0x408] sm:$0xff] }
  0xc4   :  { %2622 = vmatpush2.bf16.msra.mxu0 %v4265_v33  ;;  %v4083_v33 = vcombine.low %v244_v18, %v248_v19  ;;  %v344_v57 = vld [vmem:[#allocation5 + $0x768] sm:$0xff] }
  0xc5   :  { %2720 = vmatprep.subr.bf16.mxu0 %v4132_v35  ;;  %v4076_v35 = vcombine.high %v236_v28, %v240_v29  ;;  %v484_v59 = vld [vmem:[#allocation5 + $0xbc8] sm:$0xff] }
  0xc6   :  { %2704 = vmatpush2.bf16.msra.mxu1 %v4027_v34  ;;  %v4227_v34 = vcombine.low %v388_v21, %v392_v22  ;;  %v488_v60 = vld [vmem:[#allocation5 + $0xbe8] sm:$0xff] }
  0xc7   :  { %2705 = vmatprep.subr.bf16.mxu1 %v4020_v39  ;;  %2624 = vmatmul.mubr.bf16.vlgmr.msra.gmra.mxu0 %v4790_v42  ;;  %v372_v39 = vld [vmem:[#allocation5 + $0x848] sm:$0xff] }
  0xc8   :  { %2721 = vmatpush1.bf16.msra.mxu0 %v4131_v44  ;;  %2752 = vmatprep.mubr.bf16.mxu0 %v4771_v63  ;;  %v4075_v44 = vcombine.low %v236_v28, %v240_v29  ;;  %v4212_v47 = vcombine.high %v372_v39, %v376_v41  ;;  %v332_v2 = vld [vmem:[#allocation5 + $0x708] sm:$0xff] }
  0xc9   :  { %2722 = vmatprep.subr.bf16.mxu0 %v4124_v46  ;;  %v4196_v46 = vcombine.high %v356_v37, %v360_v38  ;;  %v336_v3 = vld [vmem:[#allocation5 + $0x728] sm:$0xff] }
  0xca   :  { %2706 = vmatpush2.bf16.msra.mxu1 %v4019_v45  ;;  %v4219_v45 = vcombine.low %v380_v30, %v384_v31  ;;  %v476_v4 = vld [vmem:[#allocation5 + $0xb88] sm:$0xff] }
  0xcb   :  { %2707 = vmatprep.subr.bf16.mxu1 %v4012_v49  ;;  %v352_v49 = vld [vmem:[#allocation5 + $0x7a8] sm:$0xff] }
  0xcc   :  { %2723 = vmatpush1.bf16.msra.mxu0 %v4123_v52  ;;  %v4195_v52 = vcombine.low %v356_v37, %v360_v38  ;;  %v480_v5 = vld [vmem:[#allocation5 + $0xba8] sm:$0xff] }
  0xcd   :  { %2724 = vmatprep.subr.bf16.mxu0 %v4116_v54  ;;  %v4188_v54 = vcombine.high %v348_v48, %v352_v49  ;;  %v324_v10 = vld [vmem:[#allocation5 + $0x6c8] sm:$0xff] }
  0xce   :  { %2708 = vmatpush2.bf16.msra.mxu1 %v4011_v53  ;;  %v4211_v53 = vcombine.low %v372_v39, %v376_v41  ;;  %v328_v11 = vld [vmem:[#allocation5 + $0x6e8] sm:$0xff] }
  0xcf   :  { %2763 = vmatprep.subr.bf16.mxu1 %v4260_v56  ;;  %v340_v56 = vld [vmem:[#allocation5 + $0x748] sm:$0xff] }
  0xd0   :  { %2725 = vmatpush1.bf16.msra.mxu0 %v4115_v61  ;;  %v4187_v61 = vcombine.low %v348_v48, %v352_v49  ;;  %v468_v12 = vld [vmem:[#allocation5 + $0xb48] sm:$0xff] }
  0xd1   :  { %2710 = vmatmul.mubr.bf16.vlgmr.msra.gmra.mxu1 %v4775_v20  ;;  %2726 = vmatprep.subr.bf16.mxu0 %v4108_v0  ;;  %v4180_v0 = vcombine.high %v340_v56, %v344_v57  ;;  %v472_v13 = vld [vmem:[#allocation5 + $0xb68] sm:$0xff] }
  0xd2   :  { %2764 = vmatpush1.bf16.msra.mxu1 %v4259_v62  ;;  %2795 = vmatprep.mubr.bf16.mxu1 %v4780_v32  ;;  %v4203_v62 = vcombine.low %v364_v50, %v368_v51  ;;  %v316_v18 = vld [vmem:[#allocation5 + $0x688] sm:$0xff] }
  0xd3   :  { %2765 = vmatprep.subr.bf16.mxu1 %v4252_v1  ;;  %v4324_v1 = vcombine.high %v484_v59, %v488_v60  ;;  %v320_v19 = vld [vmem:[#allocation5 + $0x6a8] sm:$0xff] }
  0xd4   :  { %2727 = vmatpush1.bf16.msra.mxu0 %v4107_v6  ;;  %v4179_v6 = vcombine.low %v340_v56, %v344_v57  ;;  %v460_v21 = vld [vmem:[#allocation5 + $0xb08] sm:$0xff]  ;;  %v165_v56 = vld [vmem:[#allocation5 + $0x1d0] sm:$0xff] }
  0xd5   :  { %2728 = vmatprep.subr.bf16.mxu0 %v4100_v8  ;;  %v4172_v8 = vcombine.high %v332_v2, %v336_v3  ;;  %v464_v22 = vld [vmem:[#allocation5 + $0xb28] sm:$0xff]  ;;  %v169_v57 = vld [vmem:[#allocation5 + $0x1f0] sm:$0xff] }
  0xd6   :  { %2766 = vmatpush1.bf16.msra.mxu1 %v4251_v7  ;;  %v4323_v7 = vcombine.low %v484_v59, %v488_v60  ;;  %v308_v28 = vld [vmem:[#allocation5 + $0x648] sm:$0xff] }
  0xd7   :  { %2767 = vmatprep.subr.bf16.mxu1 %v4244_v9  ;;  %v4316_v9 = vcombine.high %v476_v4, %v480_v5  ;;  %v312_v29 = vld [vmem:[#allocation5 + $0x668] sm:$0xff] }
  0xd8   :  { %2729 = vmatpush1.bf16.msra.mxu0 %v4099_v14  ;;  %v4171_v14 = vcombine.low %v332_v2, %v336_v3  ;;  %v452_v30 = vld [vmem:[#allocation5 + $0xac8] sm:$0xff]  ;;  %v293_v2 = vld [vmem:[#allocation5 + $0x5d0] sm:$0xff] }
  0xd9   :  { %2730 = vmatprep.subr.bf16.mxu0 %v4092_v16  ;;  %v4164_v16 = vcombine.high %v324_v10, %v328_v11  ;;  %v456_v31 = vld [vmem:[#allocation5 + $0xae8] sm:$0xff]  ;;  %v297_v3 = vld [vmem:[#allocation5 + $0x5f0] sm:$0xff] }
  0xda   :  { %2768 = vmatpush1.bf16.msra.mxu1 %v4243_v15  ;;  %v4315_v15 = vcombine.low %v476_v4, %v480_v5  ;;  %v300_v37 = vld [vmem:[#allocation5 + $0x608] sm:$0xff]  ;;  %v4134_v5 = vcombine.high %v293_v2, %v297_v3 }
  0xdb   :  { %2769 = vmatprep.subr.bf16.mxu1 %v4236_v17  ;;  %v4308_v17 = vcombine.high %v468_v12, %v472_v13  ;;  %v304_v38 = vld [vmem:[#allocation5 + $0x628] sm:$0xff] }
  0xdc   :  { %2731 = vmatpush1.bf16.msra.mxu0 %v4091_v24  ;;  %v4163_v24 = vcombine.low %v324_v10, %v328_v11  ;;  %v444_v39 = vld [vmem:[#allocation5 + $0xa88] sm:$0xff]  ;;  %v4005_v10 = vcombine.low %v165_v56, %v169_v57  ;;  %v4133_v11 = vcombine.low %v293_v2, %v297_v3 }
  0xdd   :  { %2732 = vmatprep.subr.bf16.mxu0 %v4084_v26  ;;  %v4156_v26 = vcombine.high %v316_v18, %v320_v19  ;;  %v448_v41 = vld [vmem:[#allocation5 + $0xaa8] sm:$0xff] }
  0xde   :  { %2770 = vmatpush1.bf16.msra.mxu1 %v4235_v25  ;;  %v4307_v25 = vcombine.low %v468_v12, %v472_v13  ;;  %v492_v48 = vld [vmem:[#allocation5 + $0xc08] sm:$0xff] }
  0xdf   :  { %2771 = vmatprep.subr.bf16.mxu1 %v4228_v27  ;;  %v4300_v27 = vcombine.high %v460_v21, %v464_v22  ;;  %v496_v49 = vld [vmem:[#allocation5 + $0xc28] sm:$0xff] }
  0xe0   :  { %2733 = vmatpush1.bf16.msra.mxu0 %v4083_v33  ;;  %v4155_v33 = vcombine.low %v316_v18, %v320_v19  ;;  %v436_v50 = vld [vmem:[#allocation5 + $0xa48] sm:$0xff] }
  0xe1   :  { %2734 = vmatprep.subr.bf16.mxu0 %v4076_v35  ;;  %v4148_v35 = vcombine.high %v308_v28, %v312_v29  ;;  %v440_v51 = vld [vmem:[#allocation5 + $0xa68] sm:$0xff] }
  0xe2   :  { %2772 = vmatpush1.bf16.msra.mxu1 %v4227_v34  ;;  %v4299_v34 = vcombine.low %v460_v21, %v464_v22  ;;  %v428_v59 = vld [vmem:[#allocation5 + $0xa08] sm:$0xff] }
  0xe3   :  { %2773 = vmatprep.subr.bf16.mxu1 %v4220_v36  ;;  %v4292_v36 = vcombine.high %v452_v30, %v456_v31  ;;  %v432_v60 = vld [vmem:[#allocation5 + $0xa28] sm:$0xff] }
  0xe4   :  { %2735 = vmatpush1.bf16.msra.mxu0 %v4075_v44  ;;  %v4147_v44 = vcombine.low %v308_v28, %v312_v29  ;;  %v4267_v4 = vcombine.low %v428_v59, %v432_v60 }
  0xe5   :  { %2736 = vmatprep.subr.bf16.mxu0 %v4196_v46  ;;  %v4140_v46 = vcombine.high %v300_v37, %v304_v38 }
  0xe6   :  { %2774 = vmatpush1.bf16.msra.mxu1 %v4219_v45  ;;  %v4291_v45 = vcombine.low %v452_v30, %v456_v31 }
  0xe7   :  { %2775 = vmatprep.subr.bf16.mxu1 %v4212_v47  ;;  %v4284_v47 = vcombine.high %v444_v39, %v448_v41 }
  0xe8   :  { %2737 = vmatpush2.bf16.msra.mxu0 %v4195_v52  ;;  %v4139_v52 = vcombine.low %v300_v37, %v304_v38 }
  0xe9   :  { %2738 = vmatprep.subr.bf16.mxu0 %v4188_v54  ;;  %v4332_v54 = vcombine.high %v492_v48, %v496_v49 }
  0xea   :  { %2776 = vmatpush1.bf16.msra.mxu1 %v4211_v53  ;;  %v4283_v53 = vcombine.low %v444_v39, %v448_v41 }
  0xeb   :  { %2777 = vmatprep.subr.bf16.mxu1 %v4204_v55  ;;  %v4276_v55 = vcombine.high %v436_v50, %v440_v51 }
  0xec   :  { %2739 = vmatpush2.bf16.msra.mxu0 %v4187_v61  ;;  %v4331_v61 = vcombine.low %v492_v48, %v496_v49 }
  0xed   :  { %2740 = vmatprep.subr.bf16.mxu0 %v4180_v0  ;;  %v4006_v0 = vcombine.high %v165_v56, %v169_v57 }
  0xee   :  { %2778 = vmatpush1.bf16.msra.mxu1 %v4203_v62  ;;  %v4275_v62 = vcombine.low %v436_v50, %v440_v51 }
  0xef   :  { %2779 = vmatprep.subr.bf16.mxu1 %v4324_v1  ;;  %v4268_v1 = vcombine.high %v428_v59, %v432_v60 }
  0xf0   :  { %2741 = vmatpush2.bf16.msra.mxu0 %v4179_v6  ;;  %v157_v6 = vld [vmem:[#allocation5 + $0x190] sm:$0xff] }
  0xf1   :  { %2742 = vmatprep.subr.bf16.mxu0 %v4172_v8  ;;  %v285_v8 = vld [vmem:[#allocation5 + $0x590] sm:$0xff] }
  0xf2   :  { %2780 = vmatpush2.bf16.msra.mxu1 %v4323_v7  ;;  %v161_v7 = vld [vmem:[#allocation5 + $0x1b0] sm:$0xff] }
  0xf3   :  { %2781 = vmatprep.subr.bf16.mxu1 %v4316_v9  ;;  %v289_v9 = vld [vmem:[#allocation5 + $0x5b0] sm:$0xff]  ;;  %v3998_v12 = vcombine.high %v157_v6, %v161_v7  ;;  %v3997_v18 = vcombine.low %v157_v6, %v161_v7 }
  0xf4   :  { %2743 = vmatpush2.bf16.msra.mxu0 %v4171_v14  ;;  %v4126_v13 = vcombine.high %v285_v8, %v289_v9  ;;  %v149_v14 = vld [vmem:[#allocation5 + $0x150] sm:$0xff]  ;;  %v4125_v19 = vcombine.low %v285_v8, %v289_v9 }
  0xf5   :  { %2744 = vmatprep.subr.bf16.mxu0 %v4164_v16  ;;  %v277_v16 = vld [vmem:[#allocation5 + $0x550] sm:$0xff] }
  0xf6   :  { %2782 = vmatpush2.bf16.msra.mxu1 %v4315_v15  ;;  %v153_v15 = vld [vmem:[#allocation5 + $0x170] sm:$0xff] }
  0xf7   :  { %2783 = vmatprep.subr.bf16.mxu1 %v4308_v17  ;;  %v281_v17 = vld [vmem:[#allocation5 + $0x570] sm:$0xff]  ;;  %v3990_v21 = vcombine.high %v149_v14, %v153_v15  ;;  %v3989_v28 = vcombine.low %v149_v14, %v153_v15 }
  0xf8   :  { %2745 = vmatpush2.bf16.msra.mxu0 %v4163_v24  ;;  %v4118_v22 = vcombine.high %v277_v16, %v281_v17  ;;  %v141_v24 = vld [vmem:[#allocation5 + $0x110] sm:$0xff]  ;;  %v4117_v29 = vcombine.low %v277_v16, %v281_v17 }
  0xf9   :  { %2746 = vmatprep.subr.bf16.mxu0 %v4156_v26  ;;  %v269_v26 = vld [vmem:[#allocation5 + $0x510] sm:$0xff] }
  0xfa   :  { %2784 = vmatpush2.bf16.msra.mxu1 %v4307_v25  ;;  %v145_v25 = vld [vmem:[#allocation5 + $0x130] sm:$0xff] }
  0xfb   :  { %2785 = vmatprep.subr.bf16.mxu1 %v4300_v27  ;;  %v273_v27 = vld [vmem:[#allocation5 + $0x530] sm:$0xff]  ;;  %v3982_v30 = vcombine.high %v141_v24, %v145_v25  ;;  %v3981_v37 = vcombine.low %v141_v24, %v145_v25 }
  0xfc   :  { %2747 = vmatpush2.bf16.msra.mxu0 %v4155_v33  ;;  %v4110_v31 = vcombine.high %v269_v26, %v273_v27  ;;  %v133_v33 = vld [vmem:[#allocation5 + $0xd0] sm:$0xff]  ;;  %v4109_v38 = vcombine.low %v269_v26, %v273_v27 }
  0xfd   :  { %2748 = vmatprep.subr.bf16.mxu0 %v4148_v35  ;;  %v261_v35 = vld [vmem:[#allocation5 + $0x4d0] sm:$0xff] }
  0xfe   :  { %2786 = vmatpush2.bf16.msra.mxu1 %v4299_v34  ;;  %v137_v34 = vld [vmem:[#allocation5 + $0xf0] sm:$0xff] }
  0xff   :  { %2787 = vmatprep.subr.bf16.mxu1 %v4292_v36  ;;  %v265_v36 = vld [vmem:[#allocation5 + $0x4f0] sm:$0xff]  ;;  %v3974_v39 = vcombine.high %v133_v33, %v137_v34  ;;  %v3973_v48 = vcombine.low %v133_v33, %v137_v34 }
 0x100   :  { %2749 = vmatpush2.bf16.msra.mxu0 %v4147_v44  ;;  %v4102_v41 = vcombine.high %v261_v35, %v265_v36  ;;  %v125_v44 = vld [vmem:[#allocation5 + $0x90] sm:$0xff]  ;;  %v4101_v49 = vcombine.low %v261_v35, %v265_v36 }
 0x101   :  { %2750 = vmatprep.subr.bf16.mxu0 %v4140_v46  ;;  %v253_v46 = vld [vmem:[#allocation5 + $0x490] sm:$0xff] }
 0x102   :  { %2788 = vmatpush2.bf16.msra.mxu1 %v4291_v45  ;;  %v129_v45 = vld [vmem:[#allocation5 + $0xb0] sm:$0xff] }
 0x103   :  { %2789 = vmatprep.subr.bf16.mxu1 %v4284_v47  ;;  %v257_v47 = vld [vmem:[#allocation5 + $0x4b0] sm:$0xff]  ;;  %v3966_v50 = vcombine.high %v125_v44, %v129_v45  ;;  %v3965_v56 = vcombine.low %v125_v44, %v129_v45 }
 0x104   :  { %2751 = vmatpush2.bf16.msra.mxu0 %v4139_v52  ;;  %v4094_v51 = vcombine.high %v253_v46, %v257_v47  ;;  %v117_v52 = vld [vmem:[#allocation5 + $0x50] sm:$0xff]  ;;  %v4093_v57 = vcombine.low %v253_v46, %v257_v47 }
 0x105   :  { %2820 = vmatprep.subr.bf16.mxu0 %v4332_v54  ;;  %v245_v54 = vld [vmem:[#allocation5 + $0x450] sm:$0xff] }
 0x106   :  { %2790 = vmatpush2.bf16.msra.mxu1 %v4283_v53  ;;  %v121_v53 = vld [vmem:[#allocation5 + $0x70] sm:$0xff] }
 0x107   :  { %2791 = vmatprep.subr.bf16.mxu1 %v4276_v55  ;;  %2753 = vmatmul.mubr.bf16.vlgmr.msra.gmra.mxu0 %v4777_v23  ;;  %v249_v55 = vld [vmem:[#allocation5 + $0x470] sm:$0xff]  ;;  %v3958_v59 = vcombine.high %v117_v52, %v121_v53  ;;  %v3957_v2 = vcombine.low %v117_v52, %v121_v53 }
 0x108   :  { %2821 = vmatpush1.bf16.msra.mxu0 %v4331_v61  ;;  %2838 = vmatprep.mubr.bf16.mxu0 %v4720_v40  ;;  %v4086_v60 = vcombine.high %v245_v54, %v249_v55  ;;  %v109_v61 = vld [vmem:[#allocation5 + $0x10] sm:$0xff]  ;;  %v4085_v3 = vcombine.low %v245_v54, %v249_v55 }
 0x109   :  { %2849 = vmatprep.subr.bf16.mxu0 %v4006_v0  ;;  %v237_v0 = vld [vmem:[#allocation5 + $0x410] sm:$0xff] }
 0x10a   :  { %2792 = vmatpush2.bf16.msra.mxu1 %v4275_v62  ;;  %v113_v62 = vld [vmem:[#allocation5 + $0x30] sm:$0xff] }
 0x10b   :  { %2793 = vmatprep.subr.bf16.mxu1 %v4268_v1  ;;  %v241_v1 = vld [vmem:[#allocation5 + $0x430] sm:$0xff] }
 0x10c   :  { %v229_v6 = vld [vmem:[#allocation5 + $0x3d0] sm:$0xff] }
 0x10d   :  { %v233_v7 = vld [vmem:[#allocation5 + $0x3f0] sm:$0xff] }
 0x10e   :  { %2794 = vmatpush2.bf16.msra.mxu1 %v4267_v4  ;;  %v3950_v4 = vcombine.high %v109_v61, %v113_v62  ;;  %v357_v8 = vld [vmem:[#allocation5 + $0x7d0] sm:$0xff] }
 0x10f   :  { %2892 = vmatprep.subr.bf16.mxu1 %v4134_v5  ;;  %4338 = vmatmul.mubr.msk.bf16.vlgmr.msra.gmra.mxu0 %vm2501_vm0, %v4785_v43  ;;  %v4078_v5 = vcombine.high %v237_v0, %v241_v1  ;;  %v361_v9 = vld [vmem:[#allocation5 + $0x7f0] sm:$0xff] }
 0x110   :  { %2850 = vmatpush1.bf16.msra.mxu0 %v4005_v10  ;;  %2881 = vmatprep.mubr.bf16.mxu0 %v4769_v58  ;;  %v3949_v10 = vcombine.low %v109_v61, %v113_v62  ;;  %v221_v14 = vld [vmem:[#allocation5 + $0x390] sm:$0xff] }
 0x111   :  { %2796 = vmatmul.mubr.bf16.vlgmr.msra.gmra.mxu1 %v4790_v42  ;;  %2851 = vmatprep.subr.bf16.mxu0 %v3998_v12  ;;  %v4070_v12 = vcombine.high %v229_v6, %v233_v7  ;;  %v225_v15 = vld [vmem:[#allocation5 + $0x3b0] sm:$0xff] }
 0x112   :  { %2893 = vmatpush1.bf16.msra.mxu1 %v4133_v11  ;;  %2924 = vmatprep.mubr.bf16.mxu1 %v4771_v63  ;;  %v4077_v11 = vcombine.low %v237_v0, %v241_v1  ;;  %v349_v16 = vld [vmem:[#allocation5 + $0x790] sm:$0xff] }
 0x113   :  { %2894 = vmatprep.subr.bf16.mxu1 %v4126_v13  ;;  %v4198_v13 = vcombine.high %v357_v8, %v361_v9  ;;  %v353_v17 = vld [vmem:[#allocation5 + $0x7b0] sm:$0xff] }
 0x114   :  { %2852 = vmatpush1.bf16.msra.mxu0 %v3997_v18  ;;  %v4069_v18 = vcombine.low %v229_v6, %v233_v7  ;;  %v213_v24 = vld [vmem:[#allocation5 + $0x350] sm:$0xff] }
 0x115   :  { %2853 = vmatprep.subr.bf16.mxu0 %v3990_v21  ;;  %v4062_v21 = vcombine.high %v221_v14, %v225_v15  ;;  %v217_v25 = vld [vmem:[#allocation5 + $0x370] sm:$0xff] }
 0x116   :  { %2895 = vmatpush1.bf16.msra.mxu1 %v4125_v19  ;;  %v4197_v19 = vcombine.low %v357_v8, %v361_v9  ;;  %v341_v26 = vld [vmem:[#allocation5 + $0x750] sm:$0xff] }
 0x117   :  { %2896 = vmatprep.subr.bf16.mxu1 %v4118_v22  ;;  %v4190_v22 = vcombine.high %v349_v16, %v353_v17  ;;  %v345_v27 = vld [vmem:[#allocation5 + $0x770] sm:$0xff] }
 0x118   :  { %2854 = vmatpush1.bf16.msra.mxu0 %v3989_v28  ;;  %v4061_v28 = vcombine.low %v221_v14, %v225_v15  ;;  %v205_v33 = vld [vmem:[#allocation5 + $0x310] sm:$0xff] }
 0x119   :  { %2855 = vmatprep.subr.bf16.mxu0 %v3982_v30  ;;  %v4054_v30 = vcombine.high %v213_v24, %v217_v25  ;;  %v209_v34 = vld [vmem:[#allocation5 + $0x330] sm:$0xff] }
 0x11a   :  { %2897 = vmatpush1.bf16.msra.mxu1 %v4117_v29  ;;  %v4189_v29 = vcombine.low %v349_v16, %v353_v17  ;;  %v333_v35 = vld [vmem:[#allocation5 + $0x710] sm:$0xff] }
 0x11b   :  { %2898 = vmatprep.subr.bf16.mxu1 %v4110_v31  ;;  %v4182_v31 = vcombine.high %v341_v26, %v345_v27  ;;  %v337_v36 = vld [vmem:[#allocation5 + $0x730] sm:$0xff] }
 0x11c   :  { %2856 = vmatpush1.bf16.msra.mxu0 %v3981_v37  ;;  %v4053_v37 = vcombine.low %v213_v24, %v217_v25  ;;  %v197_v44 = vld [vmem:[#allocation5 + $0x2d0] sm:$0xff] }
 0x11d   :  { %2857 = vmatprep.subr.bf16.mxu0 %v3974_v39  ;;  %v4046_v39 = vcombine.high %v205_v33, %v209_v34  ;;  %v201_v45 = vld [vmem:[#allocation5 + $0x2f0] sm:$0xff] }
 0x11e   :  { %2899 = vmatpush1.bf16.msra.mxu1 %v4109_v38  ;;  %v4181_v38 = vcombine.low %v341_v26, %v345_v27  ;;  %v325_v46 = vld [vmem:[#allocation5 + $0x6d0] sm:$0xff]  ;;  %v166_v26 = vld [vmem:[#allocation5 + $0x1d8] sm:$0xff] }
 0x11f   :  { %2900 = vmatprep.subr.bf16.mxu1 %v4102_v41  ;;  %v4174_v41 = vcombine.high %v333_v35, %v337_v36  ;;  %v329_v47 = vld [vmem:[#allocation5 + $0x6f0] sm:$0xff]  ;;  %v170_v27 = vld [vmem:[#allocation5 + $0x1f8] sm:$0xff] }
 0x120   :  { %2858 = vmatpush1.bf16.msra.mxu0 %v3973_v48  ;;  %v4045_v48 = vcombine.low %v205_v33, %v209_v34  ;;  %v189_v52 = vld [vmem:[#allocation5 + $0x290] sm:$0xff] }
 0x121   :  { %2859 = vmatprep.subr.bf16.mxu0 %v3966_v50  ;;  %v4038_v50 = vcombine.high %v197_v44, %v201_v45  ;;  %v193_v53 = vld [vmem:[#allocation5 + $0x2b0] sm:$0xff] }
 0x122   :  { %2901 = vmatpush1.bf16.msra.mxu1 %v4101_v49  ;;  %v4173_v49 = vcombine.low %v333_v35, %v337_v36  ;;  %v317_v54 = vld [vmem:[#allocation5 + $0x690] sm:$0xff] }
 0x123   :  { %2902 = vmatprep.subr.bf16.mxu1 %v4094_v51  ;;  %v4166_v51 = vcombine.high %v325_v46, %v329_v47  ;;  %v321_v55 = vld [vmem:[#allocation5 + $0x6b0] sm:$0xff] }
 0x124   :  { %2860 = vmatpush1.bf16.msra.mxu0 %v3965_v56  ;;  %v4037_v56 = vcombine.low %v197_v44, %v201_v45  ;;  %v181_v61 = vld [vmem:[#allocation5 + $0x250] sm:$0xff]  ;;  %v4007_v45 = vcombine.low %v166_v26, %v170_v27 }
 0x125   :  { %2861 = vmatprep.subr.bf16.mxu0 %v3958_v59  ;;  %v4030_v59 = vcombine.high %v189_v52, %v193_v53  ;;  %v185_v62 = vld [vmem:[#allocation5 + $0x270] sm:$0xff] }
 0x126   :  { %2903 = vmatpush1.bf16.msra.mxu1 %v4093_v57  ;;  %v4165_v57 = vcombine.low %v325_v46, %v329_v47  ;;  %v309_v0 = vld [vmem:[#allocation5 + $0x650] sm:$0xff] }
 0x127   :  { %2904 = vmatprep.subr.bf16.mxu1 %v4086_v60  ;;  %v4158_v60 = vcombine.high %v317_v54, %v321_v55  ;;  %v313_v1 = vld [vmem:[#allocation5 + $0x670] sm:$0xff] }
 0x128   :  { %2862 = vmatpush1.bf16.msra.mxu0 %v3957_v2  ;;  %v4029_v2 = vcombine.low %v189_v52, %v193_v53  ;;  %v173_v6 = vld [vmem:[#allocation5 + $0x210] sm:$0xff] }
 0x129   :  { %2863 = vmatprep.subr.bf16.mxu0 %v3950_v4  ;;  %v4022_v4 = vcombine.high %v181_v61, %v185_v62  ;;  %v177_v7 = vld [vmem:[#allocation5 + $0x230] sm:$0xff] }
 0x12a   :  { %2905 = vmatpush1.bf16.msra.mxu1 %v4085_v3  ;;  %v4157_v3 = vcombine.low %v317_v54, %v321_v55  ;;  %v301_v8 = vld [vmem:[#allocation5 + $0x610] sm:$0xff] }
 0x12b   :  { %2906 = vmatprep.subr.bf16.mxu1 %v4078_v5  ;;  %v4150_v5 = vcombine.high %v309_v0, %v313_v1  ;;  %v305_v9 = vld [vmem:[#allocation5 + $0x630] sm:$0xff] }
 0x12c   :  { %2864 = vmatpush1.bf16.msra.mxu0 %v3949_v10  ;;  %v4021_v10 = vcombine.low %v181_v61, %v185_v62  ;;  %v421_v14 = vld [vmem:[#allocation5 + $0x9d0] sm:$0xff] }
 0x12d   :  { %2865 = vmatprep.subr.bf16.mxu0 %v4070_v12  ;;  %v4014_v12 = vcombine.high %v173_v6, %v177_v7  ;;  %v425_v15 = vld [vmem:[#allocation5 + $0x9f0] sm:$0xff] }
 0x12e   :  { %2907 = vmatpush1.bf16.msra.mxu1 %v4077_v11  ;;  %v4149_v11 = vcombine.low %v309_v0, %v313_v1  ;;  %v493_v16 = vld [vmem:[#allocation5 + $0xc10] sm:$0xff] }
 0x12f   :  { %2908 = vmatprep.subr.bf16.mxu1 %v4198_v13  ;;  %v4142_v13 = vcombine.high %v301_v8, %v305_v9  ;;  %v497_v17 = vld [vmem:[#allocation5 + $0xc30] sm:$0xff] }
 0x130   :  { %2866 = vmatpush2.bf16.msra.mxu0 %v4069_v18  ;;  %v4013_v18 = vcombine.low %v173_v6, %v177_v7  ;;  %v413_v24 = vld [vmem:[#allocation5 + $0x990] sm:$0xff] }
 0x131   :  { %2867 = vmatprep.subr.bf16.mxu0 %v4062_v21  ;;  %v4262_v21 = vcombine.high %v421_v14, %v425_v15  ;;  %v417_v25 = vld [vmem:[#allocation5 + $0x9b0] sm:$0xff] }
 0x132   :  { %2909 = vmatpush2.bf16.msra.mxu1 %v4197_v19  ;;  %v4141_v19 = vcombine.low %v301_v8, %v305_v9  ;;  %v405_v33 = vld [vmem:[#allocation5 + $0x950] sm:$0xff]  ;;  %v4253_v35 = vcombine.low %v413_v24, %v417_v25 }
 0x133   :  { %2910 = vmatprep.subr.bf16.mxu1 %v4190_v22  ;;  %v4334_v22 = vcombine.high %v493_v16, %v497_v17  ;;  %v409_v34 = vld [vmem:[#allocation5 + $0x970] sm:$0xff] }
 0x134   :  { %2868 = vmatpush2.bf16.msra.mxu0 %v4061_v28  ;;  %v4261_v28 = vcombine.low %v421_v14, %v425_v15  ;;  %v4246_v36 = vcombine.high %v405_v33, %v409_v34  ;;  %v4245_v44 = vcombine.low %v405_v33, %v409_v34  ;;  %v365_v9 = vld [vmem:[#allocation5 + $0x810] sm:$0xff] }
 0x135   :  { %2869 = vmatprep.subr.bf16.mxu0 %v4054_v30  ;;  %v4254_v30 = vcombine.high %v413_v24, %v417_v25 }
 0x136   :  { %2911 = vmatpush2.bf16.msra.mxu1 %v4189_v29  ;;  %v4333_v29 = vcombine.low %v493_v16, %v497_v17  ;;  %v485_v17 = vld [vmem:[#allocation5 + $0xbd0] sm:$0xff] }
 0x137   :  { %2912 = vmatprep.subr.bf16.mxu1 %v4182_v31  ;;  %v4008_v31 = vcombine.high %v166_v26, %v170_v27  ;;  %v477_v27 = vld [vmem:[#allocation5 + $0xb90] sm:$0xff] }
 0x138   :  { %2870 = vmatpush2.bf16.msra.mxu0 %v4053_v37  ;;  %v397_v37 = vld [vmem:[#allocation5 + $0x910] sm:$0xff] }
 0x139   :  { %2871 = vmatprep.subr.bf16.mxu0 %v4046_v39  ;;  %v158_v39 = vld [vmem:[#allocation5 + $0x198] sm:$0xff] }
 0x13a   :  { %2913 = vmatpush2.bf16.msra.mxu1 %v4181_v38  ;;  %v401_v38 = vld [vmem:[#allocation5 + $0x930] sm:$0xff] }
 0x13b   :  { %2914 = vmatprep.subr.bf16.mxu1 %v4174_v41  ;;  %v162_v41 = vld [vmem:[#allocation5 + $0x1b8] sm:$0xff]  ;;  %v4238_v46 = vcombine.high %v397_v37, %v401_v38  ;;  %v4237_v52 = vcombine.low %v397_v37, %v401_v38  ;;  %v473_v37 = vld [vmem:[#allocation5 + $0xb70] sm:$0xff] }
 0x13c   :  { %2872 = vmatpush2.bf16.msra.mxu0 %v4045_v48  ;;  %v4000_v47 = vcombine.high %v158_v39, %v162_v41  ;;  %v389_v48 = vld [vmem:[#allocation5 + $0x8d0] sm:$0xff]  ;;  %v3999_v53 = vcombine.low %v158_v39, %v162_v41  ;;  %v230_v38 = vld [vmem:[#allocation5 + $0x3d8] sm:$0xff] }
 0x13d   :  { %2873 = vmatprep.subr.bf16.mxu0 %v4038_v50  ;;  %v150_v50 = vld [vmem:[#allocation5 + $0x158] sm:$0xff] }
 0x13e   :  { %2915 = vmatpush2.bf16.msra.mxu1 %v4173_v49  ;;  %v393_v49 = vld [vmem:[#allocation5 + $0x8f0] sm:$0xff]  ;;  %v234_v39 = vld [vmem:[#allocation5 + $0x3f8] sm:$0xff] }
 0x13f   :  { %2916 = vmatprep.subr.bf16.mxu1 %v4166_v51  ;;  %v154_v51 = vld [vmem:[#allocation5 + $0x178] sm:$0xff]  ;;  %v4230_v54 = vcombine.high %v389_v48, %v393_v49  ;;  %v4229_v61 = vcombine.low %v389_v48, %v393_v49  ;;  %v465_v48 = vld [vmem:[#allocation5 + $0xb30] sm:$0xff] }
 0x140   :  { %2874 = vmatpush2.bf16.msra.mxu0 %v4037_v56  ;;  %v3992_v55 = vcombine.high %v150_v50, %v154_v51  ;;  %v381_v56 = vld [vmem:[#allocation5 + $0x890] sm:$0xff]  ;;  %v3991_v62 = vcombine.low %v150_v50, %v154_v51  ;;  %v222_v49 = vld [vmem:[#allocation5 + $0x398] sm:$0xff] }
 0x141   :  { %2875 = vmatprep.subr.bf16.mxu0 %v4030_v59  ;;  %v142_v59 = vld [vmem:[#allocation5 + $0x118] sm:$0xff] }
 0x142   :  { %2917 = vmatpush2.bf16.msra.mxu1 %v4165_v57  ;;  %v385_v57 = vld [vmem:[#allocation5 + $0x8b0] sm:$0xff]  ;;  %v226_v50 = vld [vmem:[#allocation5 + $0x3b8] sm:$0xff] }
 0x143   :  { %2918 = vmatprep.subr.bf16.mxu1 %v4158_v60  ;;  %v146_v60 = vld [vmem:[#allocation5 + $0x138] sm:$0xff]  ;;  %v4222_v0 = vcombine.high %v381_v56, %v385_v57  ;;  %v4221_v6 = vcombine.low %v381_v56, %v385_v57  ;;  %v457_v56 = vld [vmem:[#allocation5 + $0xaf0] sm:$0xff] }
 0x144   :  { %2876 = vmatpush2.bf16.msra.mxu0 %v4029_v2  ;;  %v3984_v1 = vcombine.high %v142_v59, %v146_v60  ;;  %v373_v2 = vld [vmem:[#allocation5 + $0x850] sm:$0xff]  ;;  %v3983_v7 = vcombine.low %v142_v59, %v146_v60  ;;  %v214_v57 = vld [vmem:[#allocation5 + $0x358] sm:$0xff] }
 0x145   :  { %2877 = vmatprep.subr.bf16.mxu0 %v4022_v4  ;;  %v134_v4 = vld [vmem:[#allocation5 + $0xd8] sm:$0xff] }
 0x146   :  { %2919 = vmatpush2.bf16.msra.mxu1 %v4157_v3  ;;  %v377_v3 = vld [vmem:[#allocation5 + $0x870] sm:$0xff]  ;;  %v218_v59 = vld [vmem:[#allocation5 + $0x378] sm:$0xff] }
 0x147   :  { %2920 = vmatprep.subr.bf16.mxu1 %v4150_v5  ;;  %v138_v5 = vld [vmem:[#allocation5 + $0xf8] sm:$0xff] }
 0x148   :  { %2878 = vmatpush2.bf16.msra.mxu0 %v4021_v10  ;;  %v3976_v8 = vcombine.high %v134_v4, %v138_v5  ;;  %v369_v10 = vld [vmem:[#allocation5 + $0x830] sm:$0xff]  ;;  %v3975_v14 = vcombine.low %v134_v4, %v138_v5  ;;  %v210_v4 = vld [vmem:[#allocation5 + $0x338] sm:$0xff] }
 0x149   :  { %2879 = vmatprep.subr.bf16.mxu0 %v4014_v12  ;;  %v130_v12 = vld [vmem:[#allocation5 + $0xb8] sm:$0xff]  ;;  %v4206_v15 = vcombine.high %v365_v9, %v369_v10 }
 0x14a   :  { %2921 = vmatpush2.bf16.msra.mxu1 %v4149_v11  ;;  %v126_v11 = vld [vmem:[#allocation5 + $0x98] sm:$0xff] }
 0x14b   :  { %2922 = vmatprep.subr.bf16.mxu1 %v4142_v13  ;;  %v4213_v13 = vcombine.low %v373_v2, %v377_v3  ;;  %v3968_v16 = vcombine.high %v126_v11, %v130_v12  ;;  %v3967_v24 = vcombine.low %v126_v11, %v130_v12  ;;  %v202_v11 = vld [vmem:[#allocation5 + $0x2f8] sm:$0xff] }
 0x14c   :  { %2880 = vmatpush2.bf16.msra.mxu0 %v4013_v18  ;;  %v489_v18 = vld [vmem:[#allocation5 + $0xbf0] sm:$0xff] }
 0x14d   :  { %2935 = vmatprep.subr.bf16.mxu0 %v4262_v21  ;;  %v122_v21 = vld [vmem:[#allocation5 + $0x78] sm:$0xff]  ;;  %v4326_v25 = vcombine.high %v485_v17, %v489_v18 }
 0x14e   :  { %2923 = vmatpush2.bf16.msra.mxu1 %v4141_v19  ;;  %v118_v19 = vld [vmem:[#allocation5 + $0x58] sm:$0xff] }
 0x14f   :  { %2992 = vmatprep.subr.bf16.mxu1 %v4334_v22  ;;  %2882 = vmatmul.mubr.bf16.vlgmr.msra.gmra.mxu0 %v4775_v20  ;;  %v4205_v22 = vcombine.low %v365_v9, %v369_v10  ;;  %v3960_v26 = vcombine.high %v118_v19, %v122_v21  ;;  %v3959_v33 = vcombine.low %v118_v19, %v122_v21  ;;  %v441_v9 = vld [vmem:[#allocation5 + $0xa70] sm:$0xff]  ;;  %v198_v10 = vld [vmem:[#allocation5 + $0x2d8] sm:$0xff] }
 0x150   :  { %2936 = vmatpush1.bf16.msra.mxu0 %v4261_v28  ;;  %2967 = vmatprep.mubr.bf16.mxu0 %v4780_v32  ;;  %v481_v28 = vld [vmem:[#allocation5 + $0xbb0] sm:$0xff]  ;;  %v194_v19 = vld [vmem:[#allocation5 + $0x2b8] sm:$0xff] }
 0x151   :  { %2925 = vmatmul.mubr.bf16.vlgmr.msra.gmra.mxu1 %v4777_v23  ;;  %2937 = vmatprep.subr.bf16.mxu0 %v4254_v30  ;;  %v114_v30 = vld [vmem:[#allocation5 + $0x38] sm:$0xff]  ;;  %v4318_v34 = vcombine.high %v477_v27, %v481_v28  ;;  %v4317_v41 = vcombine.low %v477_v27, %v481_v28 }
 0x152   :  { %2993 = vmatpush1.bf16.msra.mxu1 %v4333_v29  ;;  %3010 = vmatprep.mubr.bf16.mxu1 %v4720_v40  ;;  %v110_v29 = vld [vmem:[#allocation5 + $0x18] sm:$0xff] }
 0x153   :  { %3021 = vmatprep.subr.bf16.mxu1 %v4008_v31  ;;  %v4325_v31 = vcombine.low %v485_v17, %v489_v18  ;;  %v433_v17 = vld [vmem:[#allocation5 + $0xa30] sm:$0xff]  ;;  %v190_v18 = vld [vmem:[#allocation5 + $0x298] sm:$0xff] }
 0x154   :  { %2938 = vmatpush1.bf16.msra.mxu0 %v4253_v35  ;;  %v3952_v35 = vcombine.high %v110_v29, %v114_v30  ;;  %v298_v27 = vld [vmem:[#allocation5 + $0x5f8] sm:$0xff] }
 0x155   :  { %2939 = vmatprep.subr.bf16.mxu0 %v4246_v36  ;;  %v469_v36 = vld [vmem:[#allocation5 + $0xb50] sm:$0xff]  ;;  %v182_v28 = vld [vmem:[#allocation5 + $0x258] sm:$0xff] }
 0x156   :  { %v4309_v51 = vcombine.low %v469_v36, %v473_v37 }
 0x158   :  { %2940 = vmatpush1.bf16.msra.mxu0 %v4245_v44  ;;  %v3951_v44 = vcombine.low %v110_v29, %v114_v30  ;;  %v186_v29 = vld [vmem:[#allocation5 + $0x278] sm:$0xff] }
 0x159   :  { %4339 = vmatmul.mubr.msk.bf16.vlgmr.msra.gmra.mxu1 %vm2501_vm0, %v4785_v43  ;;  %2941 = vmatprep.subr.bf16.mxu0 %v4238_v46  ;;  %v4072_v46 = vcombine.high %v230_v38, %v234_v39 }
 0x15a   :  { %3022 = vmatpush1.bf16.msra.mxu1 %v4007_v45  ;;  %3053 = vmatprep.mubr.bf16.mxu1 %v4769_v58  ;;  %v4214_v58 = vcombine.high %v373_v2, %v377_v3  ;;  %v4310_v45 = vcombine.high %v469_v36, %v473_v37  ;;  %v449_v2 = vld [vmem:[#allocation5 + $0xab0] sm:$0xff]  ;;  %v206_v3 = vld [vmem:[#allocation5 + $0x318] sm:$0xff] }
 0x15b   :  { %3023 = vmatprep.subr.bf16.mxu1 %v4000_v47  ;;  %v461_v47 = vld [vmem:[#allocation5 + $0xb10] sm:$0xff]  ;;  %v290_v36 = vld [vmem:[#allocation5 + $0x5b8] sm:$0xff] }
 0x15c   :  { %2942 = vmatpush1.bf16.msra.mxu0 %v4237_v52  ;;  %v4071_v52 = vcombine.low %v230_v38, %v234_v39  ;;  %v4301_v60 = vcombine.low %v461_v47, %v465_v48  ;;  %v174_v37 = vld [vmem:[#allocation5 + $0x218] sm:$0xff] }
 0x15d   :  { %2943 = vmatprep.subr.bf16.mxu0 %v4230_v54  ;;  %v4064_v54 = vcombine.high %v222_v49, %v226_v50  ;;  %v178_v38 = vld [vmem:[#allocation5 + $0x238] sm:$0xff] }
 0x15e   :  { %3024 = vmatpush1.bf16.msra.mxu1 %v3999_v53  ;;  %v4302_v53 = vcombine.high %v461_v47, %v465_v48  ;;  %v282_v47 = vld [vmem:[#allocation5 + $0x578] sm:$0xff] }
 0x15f   :  { %3025 = vmatprep.subr.bf16.mxu1 %v3992_v55  ;;  %v453_v55 = vld [vmem:[#allocation5 + $0xad0] sm:$0xff]  ;;  %v422_v48 = vld [vmem:[#allocation5 + $0x9d8] sm:$0xff] }
 0x160   :  { %2944 = vmatpush1.bf16.msra.mxu0 %v4229_v61  ;;  %v4063_v61 = vcombine.low %v222_v49, %v226_v50  ;;  %v4293_v5 = vcombine.low %v453_v55, %v457_v56  ;;  %v426_v49 = vld [vmem:[#allocation5 + $0x9f8] sm:$0xff] }
 0x161   :  { %2945 = vmatprep.subr.bf16.mxu0 %v4222_v0  ;;  %v4056_v0 = vcombine.high %v214_v57, %v218_v59 }
 0x162   :  { %3026 = vmatpush1.bf16.msra.mxu1 %v3991_v62  ;;  %v4294_v62 = vcombine.high %v453_v55, %v457_v56  ;;  %v274_v55 = vld [vmem:[#allocation5 + $0x538] sm:$0xff] }
 0x163   :  { %3027 = vmatprep.subr.bf16.mxu1 %v3984_v1  ;;  %v445_v1 = vld [vmem:[#allocation5 + $0xa90] sm:$0xff]  ;;  %v414_v56 = vld [vmem:[#allocation5 + $0x998] sm:$0xff] }
 0x164   :  { %2946 = vmatpush1.bf16.msra.mxu0 %v4221_v6  ;;  %v4055_v6 = vcombine.low %v214_v57, %v218_v59  ;;  %v4285_v12 = vcombine.low %v445_v1, %v449_v2  ;;  %v418_v57 = vld [vmem:[#allocation5 + $0x9b8] sm:$0xff] }
 0x165   :  { %2947 = vmatprep.subr.bf16.mxu0 %v4214_v58  ;;  %v4048_v58 = vcombine.high %v206_v3, %v210_v4 }
 0x166   :  { %3028 = vmatpush1.bf16.msra.mxu1 %v3983_v7  ;;  %v4286_v7 = vcombine.high %v445_v1, %v449_v2  ;;  %v406_v1 = vld [vmem:[#allocation5 + $0x958] sm:$0xff] }
 0x167   :  { %3029 = vmatprep.subr.bf16.mxu1 %v3976_v8  ;;  %v437_v8 = vld [vmem:[#allocation5 + $0xa50] sm:$0xff]  ;;  %v410_v2 = vld [vmem:[#allocation5 + $0x978] sm:$0xff] }
 0x168   :  { %2948 = vmatpush1.bf16.msra.mxu0 %v4213_v13  ;;  %v4047_v13 = vcombine.low %v206_v3, %v210_v4  ;;  %v4277_v21 = vcombine.low %v437_v8, %v441_v9  ;;  %v4255_v4 = vcombine.low %v414_v56, %v418_v57 }
 0x169   :  { %2949 = vmatprep.subr.bf16.mxu0 %v4206_v15  ;;  %v4040_v15 = vcombine.high %v198_v10, %v202_v11 }
 0x16a   :  { %3030 = vmatpush1.bf16.msra.mxu1 %v3975_v14  ;;  %v4278_v14 = vcombine.high %v437_v8, %v441_v9  ;;  %v398_v8 = vld [vmem:[#allocation5 + $0x918] sm:$0xff] }
 0x16b   :  { %3031 = vmatprep.subr.bf16.mxu1 %v3968_v16  ;;  %v429_v16 = vld [vmem:[#allocation5 + $0xa10] sm:$0xff]  ;;  %v402_v9 = vld [vmem:[#allocation5 + $0x938] sm:$0xff] }
 0x16c   :  { %2950 = vmatpush1.bf16.msra.mxu0 %v4205_v22  ;;  %v4039_v22 = vcombine.low %v198_v10, %v202_v11  ;;  %v4269_v30 = vcombine.low %v429_v16, %v433_v17  ;;  %v4247_v11 = vcombine.low %v406_v1, %v410_v2 }
 0x16d   :  { %2951 = vmatprep.subr.bf16.mxu0 %v4326_v25  ;;  %v4032_v25 = vcombine.high %v190_v18, %v194_v19 }
 0x16e   :  { %3032 = vmatpush1.bf16.msra.mxu1 %v3967_v24  ;;  %v4270_v24 = vcombine.high %v429_v16, %v433_v17  ;;  %v394_v16 = vld [vmem:[#allocation5 + $0x8f8] sm:$0xff] }
 0x16f   :  { %3033 = vmatprep.subr.bf16.mxu1 %v3960_v26  ;;  %v294_v26 = vld [vmem:[#allocation5 + $0x5d8] sm:$0xff] }
 0x170   :  { %2952 = vmatpush2.bf16.msra.mxu0 %v4325_v31  ;;  %v4031_v31 = vcombine.low %v190_v18, %v194_v19  ;;  %v4135_v39 = vcombine.low %v294_v26, %v298_v27  ;;  %v4239_v18 = vcombine.low %v398_v8, %v402_v9 }
 0x171   :  { %2953 = vmatprep.subr.bf16.mxu0 %v4318_v34  ;;  %v4024_v34 = vcombine.high %v182_v28, %v186_v29 }
 0x172   :  { %3034 = vmatpush1.bf16.msra.mxu1 %v3959_v33  ;;  %v4136_v33 = vcombine.high %v294_v26, %v298_v27  ;;  %v4814_v26 = vpop.f32.mrf.mxu1 }
 0x173   :  { %3035 = vmatprep.subr.bf16.mxu1 %v3952_v35  ;;  %v286_v35 = vld [vmem:[#allocation5 + $0x598] sm:$0xff] }
 0x174   :  { %2954 = vmatpush2.bf16.msra.mxu0 %v4317_v41  ;;  %v4023_v41 = vcombine.low %v182_v28, %v186_v29  ;;  %v4127_v50 = vcombine.low %v286_v35, %v290_v36 }
 0x175   :  { %2955 = vmatprep.subr.bf16.mxu0 %v4310_v45  ;;  %v4016_v45 = vcombine.high %v174_v37, %v178_v38 }
 0x176   :  { %3036 = vmatpush1.bf16.msra.mxu1 %v3951_v44  ;;  %v4128_v44 = vcombine.high %v286_v35, %v290_v36  ;;  %v378_v35 = vld [vmem:[#allocation5 + $0x878] sm:$0xff]  ;;  %v4816_v36 = vpop.f32.mrf.mxu1 }
 0x177   :  { %3037 = vmatprep.subr.bf16.mxu1 %v4072_v46  ;;  %v278_v46 = vld [vmem:[#allocation5 + $0x558] sm:$0xff] }
 0x178   :  { %2956 = vmatpush2.bf16.msra.mxu0 %v4309_v51  ;;  %v4015_v51 = vcombine.low %v174_v37, %v178_v38  ;;  %v4119_v59 = vcombine.low %v278_v46, %v282_v47 }
 0x179   :  { %2957 = vmatprep.subr.bf16.mxu0 %v4302_v53  ;;  %v4264_v53 = vcombine.high %v422_v48, %v426_v49 }
 0x17a   :  { %3038 = vmatpush2.bf16.msra.mxu1 %v4071_v52  ;;  %v4120_v52 = vcombine.high %v278_v46, %v282_v47  ;;  %v4818_v46 = vpop.f32.mrf.mxu0  ;;  %v366_v47 = vld [vmem:[#allocation5 + $0x818] sm:$0xff] }
 0x17b   :  { %3039 = vmatprep.subr.bf16.mxu1 %v4064_v54  ;;  %v270_v54 = vld [vmem:[#allocation5 + $0x518] sm:$0xff] }
 0x17c   :  { %2958 = vmatpush2.bf16.msra.mxu0 %v4301_v60  ;;  %v4263_v60 = vcombine.low %v422_v48, %v426_v49  ;;  %v4111_v3 = vcombine.low %v270_v54, %v274_v55  ;;  %v370_v48 = vld [vmem:[#allocation5 + $0x838] sm:$0xff]  ;;  %v4820_v49 = vpop.f32.mrf.mxu1 }
 0x17d   :  { %2959 = vmatprep.subr.bf16.mxu0 %v4294_v62  ;;  %v4256_v62 = vcombine.high %v414_v56, %v418_v57  ;;  %v4822_v56 = vpop.f32.mrf.mxu0  ;;  %v486_v57 = vld [vmem:[#allocation5 + $0xbd8] sm:$0xff] }
 0x17e   :  { %3040 = vmatpush2.bf16.msra.mxu1 %v4063_v61  ;;  %v4112_v61 = vcombine.high %v270_v54, %v274_v55  ;;  %v342_v54 = vld [vmem:[#allocation5 + $0x758] sm:$0xff] }
 0x17f   :  { %3041 = vmatprep.subr.bf16.mxu1 %v4056_v0  ;;  %v262_v0 = vld [vmem:[#allocation5 + $0x4d8] sm:$0xff] }
 0x180   :  { %2960 = vmatpush2.bf16.msra.mxu0 %v4293_v5  ;;  %v346_v55 = vld [vmem:[#allocation5 + $0x778] sm:$0xff] }
 0x181   :  { %2961 = vmatprep.subr.bf16.mxu0 %v4286_v7  ;;  %v254_v7 = vld [vmem:[#allocation5 + $0x498] sm:$0xff] }
 0x182   :  { %3042 = vmatpush2.bf16.msra.mxu1 %v4055_v6  ;;  %v4248_v6 = vcombine.high %v406_v1, %v410_v2  ;;  %v334_v1 = vld [vmem:[#allocation5 + $0x718] sm:$0xff] }
 0x183   :  { %3043 = vmatprep.subr.bf16.mxu1 %v4048_v58  ;;  %v258_v58 = vld [vmem:[#allocation5 + $0x4b8] sm:$0xff] }
 0x184   :  { %2962 = vmatpush2.bf16.msra.mxu0 %v4285_v12  ;;  %v4240_v12 = vcombine.high %v398_v8, %v402_v9  ;;  %v4095_v17 = vcombine.low %v254_v7, %v258_v58  ;;  %v338_v2 = vld [vmem:[#allocation5 + $0x738] sm:$0xff] }
 0x185   :  { %2963 = vmatprep.subr.bf16.mxu0 %v4278_v14  ;;  %v250_v14 = vld [vmem:[#allocation5 + $0x478] sm:$0xff]  ;;  %v4176_v8 = vcombine.high %v334_v1, %v338_v2 }
 0x186   :  { %3044 = vmatpush2.bf16.msra.mxu1 %v4047_v13  ;;  %v246_v13 = vld [vmem:[#allocation5 + $0x458] sm:$0xff] }
 0x187   :  { %3045 = vmatprep.subr.bf16.mxu1 %v4040_v15  ;;  %v390_v15 = vld [vmem:[#allocation5 + $0x8d8] sm:$0xff]  ;;  %v4087_v27 = vcombine.low %v246_v13, %v250_v14 }
 0x188   :  { %2964 = vmatpush2.bf16.msra.mxu0 %v4277_v21  ;;  %v4232_v19 = vcombine.high %v390_v15, %v394_v16  ;;  %v238_v21 = vld [vmem:[#allocation5 + $0x418] sm:$0xff]  ;;  %v4231_v28 = vcombine.low %v390_v15, %v394_v16  ;;  %v4175_v15 = vcombine.low %v334_v1, %v338_v2  ;;  %v501_v16 = vlaneseq }
 0x189   :  { %2965 = vmatprep.subr.bf16.mxu0 %v4270_v24  ;;  %v382_v24 = vld [vmem:[#allocation5 + $0x898] sm:$0xff] }
 0x18a   :  { %3046 = vmatpush2.bf16.msra.mxu1 %v4039_v22  ;;  %v242_v22 = vld [vmem:[#allocation5 + $0x438] sm:$0xff] }
 0x18b   :  { %3047 = vmatprep.subr.bf16.mxu1 %v4032_v25  ;;  %v386_v25 = vld [vmem:[#allocation5 + $0x8b8] sm:$0xff]  ;;  %v4080_v29 = vcombine.high %v238_v21, %v242_v22  ;;  %v4079_v37 = vcombine.low %v238_v21, %v242_v22 }
 0x18c   :  { %2966 = vmatpush2.bf16.msra.mxu0 %v4269_v30  ;;  %v4224_v30 = vcombine.high %v382_v24, %v386_v25  ;;  %v4223_v38 = vcombine.low %v382_v24, %v386_v25  ;;  %v318_v21 = vld [vmem:[#allocation5 + $0x698] sm:$0xff] }
 0x18d   :  { %3064 = vmatprep.subr.bf16.mxu0 %v4136_v33  ;;  %v362_v33 = vld [vmem:[#allocation5 + $0x7f8] sm:$0xff] }
 0x18e   :  { %3048 = vmatpush2.bf16.msra.mxu1 %v4031_v31  ;;  %v358_v31 = vld [vmem:[#allocation5 + $0x7d8] sm:$0xff] }
 0x18f   :  { %3049 = vmatprep.subr.bf16.mxu1 %v4024_v34  ;;  %2968 = vmatmul.mubr.bf16.vlgmr.msra.gmra.mxu0 %v4790_v42  ;;  %v374_v34 = vld [vmem:[#allocation5 + $0x858] sm:$0xff] }
 0x190   :  { %3065 = vmatpush1.bf16.msra.mxu0 %v4135_v39  ;;  %3096 = vmatprep.mubr.bf16.mxu0 %v4771_v63  ;;  %v266_v63 = vld [vmem:[#allocation5 + $0x4f8] sm:$0xff]  ;;  %v4200_v39 = vcombine.high %v358_v31, %v362_v33 }
 0x191   :  { %3066 = vmatprep.subr.bf16.mxu0 %v4128_v44  ;;  %v4104_v5 = vcombine.high %v262_v0, %v266_v63  ;;  %v4103_v10 = vcombine.low %v262_v0, %v266_v63  ;;  %v350_v44 = vld [vmem:[#allocation5 + $0x798] sm:$0xff]  ;;  %v4184_v0 = vcombine.high %v342_v54, %v346_v55 }
 0x192   :  { %3050 = vmatpush2.bf16.msra.mxu1 %v4023_v41  ;;  %v4216_v41 = vcombine.high %v374_v34, %v378_v35  ;;  %v322_v22 = vld [vmem:[#allocation5 + $0x6b8] sm:$0xff] }
 0x193   :  { %3051 = vmatprep.subr.bf16.mxu1 %v4016_v45  ;;  %v354_v45 = vld [vmem:[#allocation5 + $0x7b8] sm:$0xff] }
 0x194   :  { %3067 = vmatpush1.bf16.msra.mxu0 %v4127_v50  ;;  %v4199_v50 = vcombine.low %v358_v31, %v362_v33  ;;  %v462_v24 = vld [vmem:[#allocation5 + $0xb18] sm:$0xff]  ;;  %v4160_v33 = vcombine.high %v318_v21, %v322_v22 }
 0x195   :  { %3068 = vmatprep.subr.bf16.mxu0 %v4120_v52  ;;  %v4192_v52 = vcombine.high %v350_v44, %v354_v45  ;;  %v466_v25 = vld [vmem:[#allocation5 + $0xb38] sm:$0xff] }
 0x196   :  { %3052 = vmatpush2.bf16.msra.mxu1 %v4015_v51  ;;  %v4215_v51 = vcombine.low %v374_v34, %v378_v35  ;;  %v4304_v34 = vcombine.high %v462_v24, %v466_v25  ;;  %v310_v35 = vld [vmem:[#allocation5 + $0x658] sm:$0xff] }
 0x197   :  { %3107 = vmatprep.subr.bf16.mxu1 %v4264_v53  ;;  %v4208_v53 = vcombine.high %v366_v47, %v370_v48 }
 0x198   :  { %3069 = vmatpush1.bf16.msra.mxu0 %v4119_v59  ;;  %v490_v59 = vld [vmem:[#allocation5 + $0xbf8] sm:$0xff] }
 0x199   :  { %3054 = vmatmul.mubr.bf16.vlgmr.msra.gmra.mxu1 %v4775_v20  ;;  %3070 = vmatprep.subr.bf16.mxu0 %v4112_v61  ;;  %v4096_v20 = vcombine.high %v254_v7, %v258_v58  ;;  %v4191_v61 = vcombine.low %v350_v44, %v354_v45  ;;  %v4328_v63 = vcombine.high %v486_v57, %v490_v59 }
 0x19a   :  { %3108 = vmatpush1.bf16.msra.mxu1 %v4263_v60  ;;  %3139 = vmatprep.mubr.bf16.mxu1 %v4780_v32  ;;  %v4088_v32 = vcombine.high %v246_v13, %v250_v14  ;;  %v4824_v60 = vpop.f32.mrf.mxu1  ;;  %v4183_v7 = vcombine.low %v342_v54, %v346_v55  ;;  %v4327_v58 = vcombine.low %v486_v57, %v490_v59  ;;  %v474_v13 = vld [vmem:[#allocation5 + $0xb78] sm:$0xff] }
 0x19b   :  { %3109 = vmatprep.subr.bf16.mxu1 %v4256_v62  ;;  %v4207_v62 = vcombine.low %v366_v47, %v370_v48  ;;  %v4159_v45 = vcombine.low %v318_v21, %v322_v22  ;;  %v4303_v48 = vcombine.low %v462_v24, %v466_v25  ;;  %v302_v54 = vld [vmem:[#allocation5 + $0x618] sm:$0xff] }
 0x19c   :  { %3071 = vmatpush1.bf16.msra.mxu0 %v4111_v3  ;;  %v4826_v3 = vpop.f32.mrf.mxu0  ;;  %v306_v55 = vld [vmem:[#allocation5 + $0x638] sm:$0xff] }
 0x19d   :  { %3072 = vmatprep.subr.bf16.mxu0 %v4104_v5  ;;  %v482_v5 = vld [vmem:[#allocation5 + $0xbb8] sm:$0xff]  ;;  %v4144_v2 = vcombine.high %v302_v54, %v306_v55 }
 0x19e   :  { %3110 = vmatpush1.bf16.msra.mxu1 %v4255_v4  ;;  %v478_v4 = vld [vmem:[#allocation5 + $0xb98] sm:$0xff] }
 0x19f   :  { %3111 = vmatprep.subr.bf16.mxu1 %v4248_v6  ;;  %v4828_v6 = vpop.f32.mrf.mxu1  ;;  %v4320_v9 = vcombine.high %v478_v4, %v482_v5  ;;  %v446_v59 = vld [vmem:[#allocation5 + $0xa98] sm:$0xff] }
 0x1a0   :  { %3073 = vmatpush1.bf16.msra.mxu0 %v4103_v10  ;;  %v326_v10 = vld [vmem:[#allocation5 + $0x6d8] sm:$0xff] }
 0x1a1   :  { %3074 = vmatprep.subr.bf16.mxu0 %v4096_v20  ;;  %v2545_v20 = vpop.f32.mrf.mxu0  ;;  %v4830_v14 = vpop.f32.mrf.mxu1  ;;  %v430_v25 = vld [vmem:[#allocation5 + $0xa18] sm:$0xff] }
 0x1a2   :  { %3112 = vmatpush1.bf16.msra.mxu1 %v4247_v11  ;;  %v330_v11 = vld [vmem:[#allocation5 + $0x6f8] sm:$0xff] }
 0x1a3   :  { %3113 = vmatprep.subr.bf16.mxu1 %v4240_v12  ;;  %v470_v12 = vld [vmem:[#allocation5 + $0xb58] sm:$0xff] }
 0x1a4   :  { %3075 = vmatpush1.bf16.msra.mxu0 %v4095_v17  ;;  %v4832_v17 = vpop.f32.mrf.mxu0  ;;  %v4311_v31 = vcombine.low %v470_v12, %v474_v13 }
 0x1a5   :  { %3076 = vmatprep.subr.bf16.mxu0 %v4088_v32  ;;  %v4168_v32 = vcombine.high %v326_v10, %v330_v11 }
 0x1a6   :  { %3114 = vmatpush1.bf16.msra.mxu1 %v4239_v18  ;;  %v4319_v18 = vcombine.low %v478_v4, %v482_v5 }
 0x1a7   :  { %3115 = vmatprep.subr.bf16.mxu1 %v4232_v19  ;;  %v4312_v19 = vcombine.high %v470_v12, %v474_v13  ;;  %v442_v12 = vld [vmem:[#allocation5 + $0xa78] sm:$0xff] }
 0x1a8   :  { %3077 = vmatpush1.bf16.msra.mxu0 %v4087_v27  ;;  %v4834_v27 = vpop.f32.mrf.mxu1 }
 0x1a9   :  { %3078 = vmatprep.subr.bf16.mxu0 %v4080_v29  ;;  %v4836_v29 = vshrl.u32 %v501_v16, 7 }
 0x1aa   :  { %3116 = vmatpush1.bf16.msra.mxu1 %v4231_v28  ;;  %v4167_v28 = vcombine.low %v326_v10, %v330_v11  ;;  %v4841_v44 = vpop.f32.mrf.mxu1  ;;  %v438_v11 = vld [vmem:[#allocation5 + $0xa58] sm:$0xff] }
 0x1ab   :  { %3117 = vmatprep.subr.bf16.mxu1 %v4224_v30  ;;  %v4838_v30 = vpop.f32.mrf.mxu0 }
 0x1ac   :  { %3079 = vmatpush1.bf16.msra.mxu0 %v4079_v37  ;;  %v314_v37 = vld [vmem:[#allocation5 + $0x678] sm:$0xff] }
 0x1ad   :  { %3080 = vmatprep.subr.bf16.mxu0 %v4200_v39  ;;  %v454_v39 = vld [vmem:[#allocation5 + $0xad8] sm:$0xff]  ;;  %v4843_v47 = vpop.f32.mrf.mxu0 }
 0x1ae   :  { %3118 = vmatpush1.bf16.msra.mxu1 %v4223_v38  ;;  %v507_v38 = vsub.s32 1, %v4836_v29 }
 0x1af   :  { %3119 = vmatprep.subr.bf16.mxu1 %v4216_v41  ;;  %v458_v41 = vld [vmem:[#allocation5 + $0xaf8] sm:$0xff] }
 0x1b0   :  { %3081 = vmatpush2.bf16.msra.mxu0 %v4199_v50  ;;  %v4152_v50 = vcombine.high %v310_v35, %v314_v37  ;;  %v4295_v1 = vcombine.low %v454_v39, %v458_v41 }
 0x1b1   :  { %3082 = vmatprep.subr.bf16.mxu0 %v4192_v52  ;;  %v4847_v52 = vpop.f32.mrf.mxu1 }
 0x1b2   :  { %3120 = vmatpush1.bf16.msra.mxu1 %v4215_v51  ;;  %v4845_v51 = vld [vmem:[#allocation7] sm:$0xff] }
 0x1b3   :  { %3121 = vmatprep.subr.bf16.mxu1 %v4208_v53  ;;  %v4296_v53 = vcombine.high %v454_v39, %v458_v41  ;;  %v508_v57 = vrot.slane %v4845_v51, %v507_v38  ;;  %v2713_v4 = vpop.f32.mrf.mxu1 }
 0x1b4   :  { %3083 = vmatpush2.bf16.msra.mxu0 %v4191_v61  ;;  %v450_v61 = vld [vmem:[#allocation5 + $0xab8] sm:$0xff] }
 0x1b5   :  { %3084 = vmatprep.subr.bf16.mxu0 %v4184_v0  ;;  %v2546_v0 = vadd.f32 %v2545_v20, %v508_v57  ;;  %v4288_v5 = vcombine.high %v446_v59, %v450_v61  ;;  %v4143_v20 = vcombine.low %v302_v54, %v306_v55  ;;  %v4287_v16 = vcombine.low %v446_v59, %v450_v61 }
 0x1b6   :  { %3122 = vmatpush1.bf16.msra.mxu1 %v4207_v62  ;;  %v4151_v62 = vcombine.low %v310_v35, %v314_v37  ;;  %v4509_v35 = vld [vmem:[#allocation8 + $0x78] sm:$0xff]  }
 0x1b7   :  { %3123 = vmatprep.subr.bf16.mxu1 %v4328_v63  ;;  %v2631_v63 = vpop.f32.mrf.mxu0  ;;  %v2589_v13 = vadd.f32 %v4824_v60, %v2546_v0 }
 0x1b8   :  { %3085 = vmatpush2.bf16.msra.mxu0 %v4183_v7  ;;  %v494_v7 = vld [vmem:[#allocation5 + $0xc18] sm:$0xff] }
 0x1b9   :  { %3086 = vmatprep.subr.bf16.mxu0 %v4176_v8  ;;  %v2542_v8 = vadd.f32 %v4822_v56, %v508_v57  ;;  %v2632_v21 = vadd.f32 %v2631_v63, %v2589_v13 }
 0x1ba   :  { %3124 = vmatpush2.bf16.msra.mxu1 %v4327_v58  ;;  %v498_v58 = vld [vmem:[#allocation5 + $0xc38] sm:$0xff] }
 0x1bb   :  { %3125 = vmatprep.subr.bf16.mxu1 %v4320_v9  ;;  %v515_v9 = vsub.s32 3, %v4836_v29  ;;  %v2585_v56 = vadd.f32 %v4816_v36, %v2542_v8  ;;  %v4335_v60 = vcombine.low %v494_v7, %v498_v58  ;;  %v2675_v36 = vadd.f32 %v4841_v44, %v2632_v21  ;;  %v4510_v44 = vld [vmem:[#allocation8 + $0xf8] sm:$0xff]   ;;  %v4515_v8 = vld [vmem:[#allocation8 + $0x30] sm:$0xff]  }
 0x1bc   :  { %3087 = vmatpush2.bf16.msra.mxu0 %v4175_v15  ;;  %v511_v21 = vsub.s32 2, %v4836_v29 }
 0x1bd   :  { %3088 = vmatprep.subr.bf16.mxu0 %v4168_v32  ;;  %v4855_v32 = vpop.f32.mrf.mxu1  ;;  %v516_v22 = vrot.slane %v4845_v51, %v515_v9  ;;  %v3202_v55 = vmax.f32 %v2675_v36, 0.0  ;;  %v4529_v36 = vld [vmem:[#allocation8 + $0x50] sm:$0xff]  }
 0x1be   :  { %3126 = vmatpush2.bf16.msra.mxu1 %v4319_v18  ;;  %v4336_v18 = vcombine.high %v494_v7, %v498_v58 }
 0x1bf   :  { %3127 = vmatprep.subr.bf16.mxu1 %v4312_v19  ;;  %v4280_v19 = vcombine.high %v438_v11, %v442_v12  ;;  %v2717_v37 = vpop.f32.mrf.mxu1  ;;  %v2714_v39 = vadd.f32 %v2713_v4, %v516_v22  ;;  %v4514_v4 = vld [vmem:[#allocation8 + $0xf0] sm:$0xff]  }
 0x1c0   :  { %3089 = vmatpush2.bf16.msra.mxu0 %v4167_v28  ;;  %v434_v28 = vld [vmem:[#allocation5 + $0xa38] sm:$0xff]  ;;  %v2718_v57 = vadd.f32 %v2717_v37, %v516_v22  ;;  %v4523_v22 = vld [vmem:[#allocation8 + $0x20] sm:$0xff]  }
 0x1c1   :  { %3090 = vmatprep.subr.bf16.mxu0 %v4160_v33  ;;  %v4272_v38 = vcombine.high %v430_v25, %v434_v28 }
 0x1c2   :  { %3128 = vmatpush2.bf16.msra.mxu1 %v4311_v31  ;;  %v2628_v31 = vadd.f32 %v4838_v30, %v2585_v56  ;;  %v4522_v56 = vld [vmem:[#allocation8 + $0xe0] sm:$0xff]  }
 0x1c3   :  { %3129 = vmatprep.subr.bf16.mxu1 %v4304_v34  ;;  %v4279_v34 = vcombine.low %v438_v11, %v442_v12  ;;  %v4516_v11 = vld [vmem:[#allocation8 + $0xb0] sm:$0xff]   ;;  %v4517_v12 = vld [vmem:[#allocation8 + $0x68] sm:$0xff]  }
 0x1c4   :  { %3091 = vmatpush2.bf16.msra.mxu0 %v4159_v45  ;;  %v2671_v30 = vadd.f32 %v4830_v14, %v2628_v31  ;;  %v4512_v14 = vld [vmem:[#allocation8 + $0xb8] sm:$0xff]  }
 0x1c5   :  { %3092 = vmatprep.subr.bf16.mxu0 %v4152_v50  ;;  %v4526_v31 = vld [vmem:[#allocation8 + $0xd8] sm:$0xff]  }
 0x1c6   :  { %3130 = vmatpush2.bf16.msra.mxu1 %v4303_v48  ;;  %v3194_v0 = vmax.f32 %v2671_v30, 0.0  ;;  %v4530_v30 = vld [vmem:[#allocation8 + $0xd0] sm:$0xff]  }
 0x1c7   :  { %3131 = vmatprep.subr.bf16.mxu1 %v4296_v53  ;;  %v4852_v10 = vpop.f32.mrf.mxu0  ;;  %v4271_v53 = vcombine.low %v430_v25, %v434_v28  ;;  %v4524_v28 = vld [vmem:[#allocation8 + $0xa0] sm:$0xff]  }
 0x1c8   :  { %3093 = vmatpush2.bf16.msra.mxu0 %v4151_v62  ;;  %v4511_v62 = vld [vmem:[#allocation8 + $0x38] sm:$0xff]   ;;  %v3210_v58 = vpack.c.bf16 %v3202_v55, %v3194_v0  ;;  %v4533_v55 = vld [vmem:[#allocation8 + $0x48] sm:$0xff]  }
 0x1c9   :  { %v2756_v15 = vpop.f32.mrf.mxu0  ;;  %3094 = vmatprep.subr.bf16.mxu0 %v4144_v2  ;;  %v4513_v2 = vld [vmem:[#allocation8 + $0x70] sm:$0xff]  }
 0x1ca   :  { %3132 = vmatpush2.bf16.msra.mxu1 %v4295_v1  ;;  %v2757_v48 = vadd.f32 %v2756_v15, %v2714_v39 }
 0x1cb   :  { %3133 = vmatprep.subr.bf16.mxu1 %v4288_v5  ;;  %v4859_v24 = vpop.f32.mrf.mxu0 }
 0x1cc   :  { %3095 = vmatpush2.bf16.msra.mxu0 %v4143_v20  ;;  %v4518_v20 = vld [vmem:[#allocation8 + $0xe8] sm:$0xff]  }
 0x1cd   :  { %v2760_v33 = vpop.f32.mrf.mxu0  ;;  %3164 = vmatprep.subr.bf16.mxu0 %v4336_v18  ;;  %v503_v18 = vsub.s32 0, %v4836_v29 }
 0x1ce   :  { %3134 = vmatpush2.bf16.msra.mxu1 %v4287_v16  ;;  %v4519_v16 = vld [vmem:[#allocation8 + $0x28] sm:$0xff]  }
 0x1cf   :  { %3135 = vmatprep.subr.bf16.mxu1 %v4280_v19  ;;  %3097 = vmatmul.mubr.bf16.vlgmr.msra.gmra.mxu0 %v4777_v23  ;;  %v4864_v41 = vpop.f32.mrf.mxu0  ;;  %v4521_v19 = vld [vmem:[#allocation8 + $0x60] sm:$0xff]   ;;  %v504_v25 = vrot.slane %v4845_v51, %v503_v18  ;;  %v4550_v18 = vld [vmem:[#allocation8 + $0x118] sm:$0xff]  }
 0x1d0   :  { %3165 = vmatpush1.bf16.msra.mxu0 %v4335_v60  ;;  %3182 = vmatprep.mubr.bf16.mxu0 %v4720_v40  ;;  %v2761_v40 = vadd.f32 %v2760_v33, %v2718_v57  ;;  %v4525_v60 = vld [vmem:[#allocation8 + $0x58] sm:$0xff]  }
 0x1d1   :  { %v4866_v45 = vpop.f32.mrf.mxu1  ;;  %v2842_v50 = vpop.f32.mrf.mxu0  ;;  %4406 = vmatprep.subr.bf16.mxu0 %v4509_v35  ;;  %v2544_v33 = vadd.f32 %v4826_v3, %v504_v25  ;;  %v4527_v35 = vld [vmem:[#allocation8 + $0x18] sm:$0xff]   ;;  %v2540_v37 = vadd.f32 %v4818_v46, %v504_v25  ;;  %v4556_v25 = vld [vmem:[#allocation8 + $0x100] sm:$0xff]  }
 0x1d2   :  { %3136 = vmatpush2.bf16.msra.mxu1 %v4279_v34  ;;  %v512_v34 = vrot.slane %v4845_v51, %v511_v21  ;;  %v4555_v21 = vld [vmem:[#allocation8 + $0x140] sm:$0xff]  }
 0x1d3   :  { %v2799_v54 = vpop.f32.mrf.mxu1  ;;  %3137 = vmatprep.subr.bf16.mxu1 %v4272_v38  ;;  %v4870_v59 = vpop.f32.mrf.mxu0  ;;  %v4528_v38 = vld [vmem:[#allocation8 + $0x98] sm:$0xff]  }
 0x1d4   :  { %v2800_v23 = vadd.f32 %v2799_v54, %v2757_v48  ;;  %v2716_v39 = vadd.f32 %v4855_v32, %v512_v34  ;;  %v2587_v48 = vadd.f32 %v4820_v49, %v2544_v33  ;;  %v2583_v54 = vadd.f32 %v4814_v26, %v2540_v37  ;;  %v4534_v49 = vld [vmem:[#allocation8 + $0xc8] sm:$0xff]   ;;  %v4566_v33 = vld [vmem:[#allocation8 + $0x198] sm:$0xff]  }
 0x1d5   :  { %v4872_v61 = vpop.f32.mrf.mxu1  ;;  %v2846_v1 = vpop.f32.mrf.mxu0  ;;  %v4569_v37 = vld [vmem:[#allocation8 + $0x1c8] sm:$0xff]  }
 0x1d6   :  { %3138 = vmatpush2.bf16.msra.mxu1 %v4271_v53  ;;  %v2843_v5 = vadd.f32 %v2842_v50, %v2800_v23  ;;  %v2712_v50 = vadd.f32 %v4847_v52, %v512_v34  ;;  %v2759_v3 = vadd.f32 %v4859_v24, %v2716_v39  ;;  %v4531_v53 = vld [vmem:[#allocation8 + $0x10] sm:$0xff]   ;;  %v2630_v46 = vadd.f32 %v4843_v47, %v2587_v48  ;;  %v4535_v23 = vld [vmem:[#allocation8 + $0x8] sm:$0xff]   ;;  %v4572_v39 = vld [vmem:[#allocation8 + $0x180] sm:$0xff]  }
 0x1d7   :  { %v2803_v63 = vpop.f32.mrf.mxu1  ;;  %4428 = vmatprep.subr.bf16.mxu1 %v4510_v44  ;;  %4340 = vmatmul.mubr.msk.bf16.vlgmr.msra.gmra.mxu0 %vm2501_vm0, %v4785_v43  ;;  %v4532_v44 = vld [vmem:[#allocation8 + $0x90] sm:$0xff]   ;;  %v2626_v52 = vadd.f32 %v4832_v17, %v2583_v54  ;;  %v4536_v47 = vld [vmem:[#allocation8 + $0x88] sm:$0xff]   ;;  %v4539_v17 = vld [vmem:[#allocation8] sm:$0xff]   ;;  %v519_v54 = vsub.s32 4, %v4836_v29 }
 0x1d8   :  { %v2804_v7 = vadd.f32 %v2803_v63, %v2761_v40  ;;  %4407 = vmatpush3.bf16.msra.mxu0 %v4511_v62  ;;  %3768 = vmatprep.mubr.bf16.mxu0 %v3210_v58  ;;  %v3196_v13 = vmax.f32 %v2843_v5, 0.0  ;;  %v2755_v32 = vadd.f32 %v4852_v10, %v2712_v50  ;;  %v2802_v57 = vadd.f32 %v4872_v61, %v2759_v3  ;;  %v4537_v62 = vld [vmem:[#allocation8 + $0x40] sm:$0xff]   ;;  %v4541_v63 = vld [vmem:[#allocation8 + $0x178] sm:$0xff]   ;;  %v4559_v58 = vld [vmem:[#allocation8 + $0x1f0] sm:$0xff]  }
 0x1d9   :  { %3140 = vmatmul.mubr.bf16.vlgmr.msra.gmra.mxu1 %v4790_v42  ;;  %4408 = vmatprep.subr.bf16.mxu0 %v4513_v2  ;;  %v4520_v42 = vld [vmem:[#allocation8 + $0xa8] sm:$0xff]   ;;  %v2673_v26 = vadd.f32 %v4834_v27, %v2630_v46  ;;  %v4538_v10 = vld [vmem:[#allocation8 + $0xc0] sm:$0xff]   ;;  %v2669_v61 = vadd.f32 %v4828_v6, %v2626_v52  ;;  %v4543_v6 = vld [vmem:[#allocation8 + $0x170] sm:$0xff]  }
 0x1da   :  { %v2847_v9 = vadd.f32 %v2846_v1, %v2804_v7  ;;  %4429 = vmatpush3.bf16.msra.mxu1 %v4512_v14  ;;  %v2798_v24 = vadd.f32 %v4866_v45, %v2755_v32  ;;  %v2845_v0 = vadd.f32 %v4870_v59, %v2802_v57  ;;  %v4540_v45 = vld [vmem:[#allocation8 + $0x80] sm:$0xff]   ;;  %v4557_v1 = vld [vmem:[#allocation8 + $0x1f8] sm:$0xff]   ;;  %v4567_v34 = vld [vmem:[#allocation8 + $0x1d0] sm:$0xff]   ;;  %v520_v32 = vrot.slane %v4845_v51, %v519_v54 }
 0x1db   :  { %4430 = vmatprep.subr.bf16.mxu1 %v4514_v4  ;;  %v3201_v14 = vmax.f32 %v2673_v26, 0.0  ;;  %v3193_v2 = vmax.f32 %v2669_v61, 0.0  ;;  %v4542_v59 = vld [vmem:[#allocation8 + $0x138] sm:$0xff]  }
 0x1dc   :  { %v3204_v15 = vmax.f32 %v2847_v9, 0.0  ;;  %4409 = vmatpush3.bf16.msra.mxu0 %v4515_v8  ;;  %v2841_v40 = vadd.f32 %v4864_v41, %v2798_v24  ;;  %v3203_v27 = vmax.f32 %v2845_v0, 0.0  ;;  %v4558_v7 = vld [vmem:[#allocation8 + $0x1b8] sm:$0xff]   ;;  %v4544_v8 = vld [vmem:[#allocation8 + $0x130] sm:$0xff]   ;;  %v4545_v9 = vld [vmem:[#allocation8 + $0x168] sm:$0xff]  }
 0x1dd   :  { %4410 = vmatprep.subr.bf16.mxu0 %v4517_v12  ;;  %v3209_v5 = vpack.c.bf16 %v3201_v14, %v3193_v2  ;;  %v4561_v12 = vld [vmem:[#allocation8 + $0x1e8] sm:$0xff]  }
 0x1de   :  { %v3212_v43 = vpack.c.bf16 %v3204_v15, %v3196_v13  ;;  %4431 = vmatpush3.bf16.msra.mxu1 %v4516_v11  ;;  %v3195_v4 = vmax.f32 %v2841_v40, 0.0  ;;  %v4560_v11 = vld [vmem:[#allocation8 + $0x1b0] sm:$0xff]   ;;  %v4547_v13 = vld [vmem:[#allocation8 + $0x160] sm:$0xff]  }
 0x1df   :  { %4432 = vmatprep.subr.bf16.mxu1 %v4518_v20  ;;  %v4546_v20 = vld [vmem:[#allocation8 + $0x128] sm:$0xff]   ;;  %v4548_v15 = vld [vmem:[#allocation8 + $0x120] sm:$0xff]  }
 0x1e0   :  { %3809 = vmatprep.mubr.bf16.mxu1 %v3212_v43  ;;  %4411 = vmatpush3.bf16.msra.mxu0 %v4519_v16  ;;  %v3211_v41 = vpack.c.bf16 %v3203_v27, %v3195_v4  ;;  %v4549_v16 = vld [vmem:[#allocation8 + $0x158] sm:$0xff]   ;;  %v4551_v43 = vld [vmem:[#allocation8 + $0x150] sm:$0xff]  }
 0x1e1   :  { %4412 = vmatprep.subr.bf16.mxu0 %v4521_v19  ;;  %v4553_v19 = vld [vmem:[#allocation8 + $0x148] sm:$0xff]  }
 0x1e2   :  { %4433 = vmatpush3.bf16.msra.mxu1 %v4520_v42  ;;  %v4552_v42 = vld [vmem:[#allocation8 + $0x110] sm:$0xff]  }
 0x1e3   :  { %4434 = vmatprep.subr.bf16.mxu1 %v4522_v56  ;;  %v4554_v56 = vld [vmem:[#allocation8 + $0x108] sm:$0xff]  }
 0x1e4   :  { %4413 = vmatpush3.bf16.msra.mxu0 %v4523_v22  ;;  %v4562_v22 = vld [vmem:[#allocation8 + $0x1a8] sm:$0xff]  }
 0x1e5   :  { %4414 = vmatprep.subr.bf16.mxu0 %v4525_v60  ;;  %v4564_v60 = vld [vmem:[#allocation8 + $0x1a0] sm:$0xff]  }
 0x1e6   :  { %4435 = vmatpush3.bf16.msra.mxu1 %v4524_v28  ;;  %v4563_v28 = vld [vmem:[#allocation8 + $0x1e0] sm:$0xff]  }
 0x1e7   :  { %4436 = vmatprep.subr.bf16.mxu1 %v4526_v31  ;;  %v4565_v31 = vld [vmem:[#allocation8 + $0x1d8] sm:$0xff]  }
 0x1e8   :  { %4415 = vmatpush3.bf16.msra.mxu0 %v4527_v35  ;;  %v4568_v35 = vld [vmem:[#allocation8 + $0x190] sm:$0xff]  }
 0x1e9   :  { %4416 = vmatprep.subr.bf16.mxu0 %v4529_v36  ;;  %v4571_v36 = vld [vmem:[#allocation8 + $0x1c0] sm:$0xff]  }
 0x1ea   :  { %4437 = vmatpush3.bf16.msra.mxu1 %v4528_v38  ;;  %v4570_v38 = vld [vmem:[#allocation8 + $0x188] sm:$0xff]  }
 0x1eb   :  { %4438 = vmatprep.subr.bf16.mxu1 %v4530_v30 }
 0x1ec   :  { %4417 = vmatpush3.bf16.msra.mxu0 %v4531_v53  ;;  %v523_v53 = vsub.s32 5, %v4836_v29 }
 0x1ed   :  { %4418 = vmatprep.subr.bf16.mxu0 %v4533_v55 }
 0x1ee   :  { %4439 = vmatpush3.bf16.msra.mxu1 %v4532_v44  ;;  %v524_v55 = vrot.slane %v4845_v51, %v523_v53 }
 0x1ef   :  { %4440 = vmatprep.subr.bf16.mxu1 %v4534_v49 }
 0x1f0   :  { %4419 = vmatpush3.bf16.msra.mxu0 %v4535_v23 }
 0x1f1   :  { %4420 = vmatprep.subr.bf16.mxu0 %v4537_v62 }
 0x1f2   :  { %4441 = vmatpush3.bf16.msra.mxu1 %v4536_v47 }
 0x1f3   :  { %4442 = vmatprep.subr.bf16.mxu1 %v4538_v10 }
 0x1f4   :  { %4421 = vmatpush3.bf16.msra.mxu0 %v4539_v17 }
 0x1f5   :  { %4450 = vmatprep.subr.bf16.mxu0 %v4541_v63 }
 0x1f6   :  { %4443 = vmatpush3.bf16.msra.mxu1 %v4540_v45 }
 0x1f7   :  { %4472 = vmatprep.subr.bf16.mxu1 %v4557_v1  ;;  %3769 = vmatmul.mubr.bf16.vlgmr.msra.gmra.mxu0 %v3209_v5 }
 0x1f8   :  { %4451 = vmatpush3.bf16.msra.mxu0 %v4542_v59 }
 0x1f9   :  { %3810 = vmatmul.mubr.bf16.vlgmr.msra.gmra.mxu1 %v3211_v41  ;;  %4452 = vmatprep.subr.bf16.mxu0 %v4543_v6 }
 0x1fa   :  { %4473 = vmatpush3.bf16.msra.mxu1 %v4558_v7 }
 0x1fb   :  { %4474 = vmatprep.subr.bf16.mxu1 %v4559_v58 }
 0x1fc   :  { %4453 = vmatpush3.bf16.msra.mxu0 %v4544_v8 }
 0x1fd   :  { %4454 = vmatprep.subr.bf16.mxu0 %v4545_v9 }
 0x1fe   :  { %4475 = vmatpush3.bf16.msra.mxu1 %v4560_v11 }
 0x1ff   :  { %4476 = vmatprep.subr.bf16.mxu1 %v4561_v12 }
 0x200   :  { %4455 = vmatpush3.bf16.msra.mxu0 %v4546_v20 }
 0x201   :  { %4456 = vmatprep.subr.bf16.mxu0 %v4547_v13 }
 0x202   :  { %4477 = vmatpush3.bf16.msra.mxu1 %v4562_v22 }
 0x203   :  { %4478 = vmatprep.subr.bf16.mxu1 %v4563_v28 }
 0x204   :  { %4457 = vmatpush3.bf16.msra.mxu0 %v4548_v15 }
 0x205   :  { %4458 = vmatprep.subr.bf16.mxu0 %v4549_v16 }
 0x206   :  { %4479 = vmatpush3.bf16.msra.mxu1 %v4564_v60 }
 0x207   :  { %4480 = vmatprep.subr.bf16.mxu1 %v4565_v31 }
 0x208   :  { %4459 = vmatpush3.bf16.msra.mxu0 %v4550_v18  ;;  %v531_v18 = vsub.s32 7, %v4836_v29 }
 0x209   :  { %4460 = vmatprep.subr.bf16.mxu0 %v4551_v43 }
 0x20a   :  { %4481 = vmatpush3.bf16.msra.mxu1 %v4566_v33 }
 0x20b   :  { %4482 = vmatprep.subr.bf16.mxu1 %v4567_v34 }
 0x20c   :  { %4461 = vmatpush3.bf16.msra.mxu0 %v4552_v42  ;;  %v527_v42 = vsub.s32 6, %v4836_v29 }
 0x20d   :  { %4462 = vmatprep.subr.bf16.mxu0 %v4553_v19 }
 0x20e   :  { %4483 = vmatpush3.bf16.msra.mxu1 %v4568_v35 }
 0x20f   :  { %4484 = vmatprep.subr.bf16.mxu1 %v4569_v37  ;;  %v2883_v50 = vpop.f32.mrf.mxu0 }
 0x210   :  { %4463 = vmatpush3.bf16.msra.mxu0 %v4554_v56  ;;  %v2884_v24 = vadd.f32 %v2883_v50, %v520_v32 }
 0x211   :  { %4464 = vmatprep.subr.bf16.mxu0 %v4555_v21  ;;  %v2926_v30 = vpop.f32.mrf.mxu1  ;;  %v2885_v46 = vpop.f32.mrf.mxu0  ;;  %v532_v21 = vrot.slane %v4845_v51, %v531_v18 }
 0x212   :  { %4485 = vmatpush3.bf16.msra.mxu1 %v4570_v38  ;;  %v2886_v52 = vadd.f32 %v2885_v46, %v524_v55  ;;  %v2927_v61 = vadd.f32 %v2926_v30, %v2884_v24 }
 0x213   :  { %4486 = vmatprep.subr.bf16.mxu1 %v4571_v36  ;;  %v2928_v48 = vpop.f32.mrf.mxu1  ;;  %v2887_v57 = vpop.f32.mrf.mxu0 }
 0x214   :  { %4465 = vmatpush3.bf16.msra.mxu0 %v4556_v25  ;;  %v2888_v26 = vadd.f32 %v2887_v57, %v520_v32  ;;  %v2929_v0 = vadd.f32 %v2928_v48, %v2886_v52  ;;  %v528_v25 = vrot.slane %v4845_v51, %v527_v42 }
 0x215   :  { %v2930_v3 = vpop.f32.mrf.mxu1  ;;  %v2889_v23 = vpop.f32.mrf.mxu0 }
 0x216   :  { %4487 = vmatpush3.bf16.msra.mxu1 %v4572_v39  ;;  %v2890_v10 = vadd.f32 %v2889_v23, %v524_v55  ;;  %v2931_v17 = vadd.f32 %v2930_v3, %v2888_v26 }
 0x217   :  { %v2932_v44 = vpop.f32.mrf.mxu1 }
 0x218   :  { %v2933_v1 = vadd.f32 %v2932_v44, %v2890_v10 }
 0x219   :  { %v3012_v49 = vpop.f32.mrf.mxu1 }
 0x21b   :  { %v3014_v47 = vpop.f32.mrf.mxu1 }
 0x21d   :  { %v3016_v45 = vpop.f32.mrf.mxu1 }
 0x21f   :  { %v3018_v7 = vpop.f32.mrf.mxu1 }
 0x24f   :  { %v2969_v62 = vpop.f32.mrf.mxu0 }
 0x250   :  { %v2970_v63 = vadd.f32 %v2969_v62, %v2927_v61 }
 0x251   :  { %v2971_v40 = vpop.f32.mrf.mxu0 }
 0x252   :  { %v2972_v14 = vadd.f32 %v2971_v40, %v2929_v0  ;;  %v3013_v41 = vadd.f32 %v3012_v49, %v2970_v63 }
 0x253   :  { %v2973_v27 = vpop.f32.mrf.mxu0 }
 0x254   :  { %v2974_v2 = vadd.f32 %v2973_v27, %v2931_v17  ;;  %v3015_v59 = vadd.f32 %v3014_v47, %v2972_v14  ;;  %v3197_v12 = vmax.f32 %v3013_v41, 0.0 }
 0x255   :  { %v2975_v4 = vpop.f32.mrf.mxu0 }
 0x256   :  { %v3017_v5 = vadd.f32 %v3016_v45, %v2974_v2  ;;  %v2976_v6 = vadd.f32 %v2975_v4, %v2933_v1  ;;  %v3198_v9 = vmax.f32 %v3015_v59, 0.0  ;;  %v4341_v4 = vld [vmem:[#allocation10] ss:$0 sm:$0xff] }
 0x258   :  { %v3019_v58 = vadd.f32 %v3018_v7, %v2976_v6  ;;  %v3205_v8 = vmax.f32 %v3017_v5, 0.0 }
 0x259   :  { %v3055_v15 = vpop.f32.mrf.mxu1 }
 0x25a   :  { %v3206_v11 = vmax.f32 %v3019_v58, 0.0  ;;  %v3213_v13 = vpack.c.bf16 %v3205_v8, %v3197_v12  ;;  %v3056_v34 = vadd.f32 %v3055_v15, %v528_v25 }
 0x25b   :  { %v3057_v16 = vpop.f32.mrf.mxu1 }
 0x25c   :  { %v3214_v20 = vpack.c.bf16 %v3206_v11, %v3198_v9  ;;  %v3058_v31 = vadd.f32 %v3057_v16, %v532_v21 }
 0x25d   :  { %v3059_v56 = vpop.f32.mrf.mxu1 }
 0x25e   :  { %3850 = vmatprep.mubr.bf16.mxu0 %v3214_v20  ;;  %v3060_v37 = vadd.f32 %v3059_v56, %v528_v25 }
 0x25f   :  { %3851 = vmatmul.mubr.bf16.vlgmr.msra.gmra.mxu0 %v3213_v13  ;;  %v3061_v60 = vpop.f32.mrf.mxu1 }
 0x260   :  { %v3062_v48 = vadd.f32 %v3061_v60, %v532_v21 }
 0x28f   :  { %v3098_v43 = vpop.f32.mrf.mxu0 }
 0x290   :  { %v3099_v39 = vadd.f32 %v3098_v43, %v3056_v34 }
 0x291   :  { %v3100_v19 = vpop.f32.mrf.mxu0 }
 0x292   :  { %v3101_v38 = vadd.f32 %v3100_v19, %v3058_v31 }
 0x293   :  { %v3102_v22 = vpop.f32.mrf.mxu0 }
 0x294   :  { %v3103_v29 = vadd.f32 %v3102_v22, %v3060_v37 }
 0x295   :  { %v3104_v28 = vpop.f32.mrf.mxu0 }
 0x296   :  { %v3105_v46 = vadd.f32 %v3104_v28, %v3062_v48 }
 0x297   :  { %v3184_v33 = vpop.f32.mrf.mxu0 }
 0x299   :  { %v3141_v35 = vpop.f32.mrf.mxu1  ;;  %v3186_v36 = vpop.f32.mrf.mxu0 }
 0x29a   :  { %v3142_v53 = vadd.f32 %v3141_v35, %v3099_v39 }
 0x29b   :  { %v3143_v30 = vpop.f32.mrf.mxu1  ;;  %v3188_v3 = vpop.f32.mrf.mxu0 }
 0x29c   :  { %v3144_v50 = vadd.f32 %v3143_v30, %v3101_v38  ;;  %v3185_v52 = vadd.f32 %v3184_v33, %v3142_v53 }
 0x29d   :  { %v3145_v54 = vpop.f32.mrf.mxu1  ;;  %v3190_v55 = vpop.f32.mrf.mxu0 }
 0x29e   :  { %v3146_v44 = vadd.f32 %v3145_v54, %v3103_v29  ;;  %v3187_v32 = vadd.f32 %v3186_v36, %v3144_v50  ;;  %v3199_v62 = vmax.f32 %v3185_v52, 0.0 }
 0x29f   :  { %v3147_v51 = vpop.f32.mrf.mxu1 }
 0x2a0   :  { %v3189_v57 = vadd.f32 %v3188_v3, %v3146_v44  ;;  %v3148_v49 = vadd.f32 %v3147_v51, %v3105_v46  ;;  %v3200_v26 = vmax.f32 %v3187_v32, 0.0 }
 0x2a2   :  { %v3191_v24 = vadd.f32 %v3190_v55, %v3148_v49  ;;  %v3207_v23 = vmax.f32 %v3189_v57, 0.0 }
 0x2a4   :  { %v3208_v47 = vmax.f32 %v3191_v24, 0.0  ;;  %v3215_v10 = vpack.c.bf16 %v3207_v23, %v3199_v62 }
 0x2a6   :  { %v3216_v0 = vpack.c.bf16 %v3208_v47, %v3200_v26 }
 0x2a8   :  { %3891 = vmatprep.mubr.bf16.mxu1 %v3216_v0 }
 0x2a9   :  { %3892 = vmatmul.mubr.bf16.vlgmr.msra.gmra.mxu1 %v3215_v10 }
 0x2b7   :  { %v4422_v61 = vpop.f32.mrf.mxu0 }
 0x2b9   :  { %v4423_v40 = vpop.f32.mrf.mxu0  ;;  %v4444_v14 = vpop.f32.mrf.mxu1 }
 0x2ba   :  { %v4424_v2 = vadd.f32 %v4423_v40, %v4422_v61 }
 0x2bb   :  { %v4425_v17 = vpop.f32.mrf.mxu0  ;;  %v4445_v27 = vpop.f32.mrf.mxu1 }
 0x2bc   :  { %v3771_v6 = vadd.f32 %v4424_v2, %v4341_v4  ;;  %v4446_v58 = vadd.f32 %v4445_v27, %v4444_v14 }
 0x2bd   :  { %v4426_v45 = vpop.f32.mrf.mxu0  ;;  %v4447_v59 = vpop.f32.mrf.mxu1 }
 0x2be   :  { %v4427_v7 = vadd.f32 %v4426_v45, %v4425_v17  ;;  %v3812_v12 = vadd.f32 %v4446_v58, %v3771_v6 }
 0x2bf   :  { %v4448_v41 = vpop.f32.mrf.mxu1 }
 0x2c0   :  { %v3774_v20 = vadd.f32 %v4427_v7, %v4341_v4  ;;  %v4449_v15 = vadd.f32 %v4448_v41, %v4447_v59 }
 0x2c2   :  { %v3815_v19 = vadd.f32 %v4449_v15, %v3774_v20 }
 0x31f   :  { %v4466_v63 = vpop.f32.mrf.mxu0 }
 0x321   :  { %v4467_v1 = vpop.f32.mrf.mxu0 }
 0x322   :  { %v4468_v8 = vadd.f32 %v4467_v1, %v4466_v63 }
 0x323   :  { %v4469_v5 = vpop.f32.mrf.mxu0 }
 0x324   :  { %v3853_v16 = vadd.f32 %v4468_v8, %v3812_v12 }
 0x325   :  { %v4470_v9 = vpop.f32.mrf.mxu0 }
 0x326   :  { %v4471_v18 = vadd.f32 %v4470_v9, %v4469_v5 }
 0x328   :  { %v3856_v22 = vadd.f32 %v4471_v18, %v3815_v19 }
 0x369   :  { %v4488_v11 = vpop.f32.mrf.mxu1 }
 0x36b   :  { %v4489_v13 = vpop.f32.mrf.mxu1 }
 0x36c   :  { %v4490_v43 = vadd.f32 %v4489_v13, %v4488_v11 }
 0x36d   :  { %v4491_v42 = vpop.f32.mrf.mxu1 }
 0x36e   :  { %v3894_v56 = vadd.f32 %v4490_v43, %v3853_v16 }
 0x36f   :  { %v4492_v21 = vpop.f32.mrf.mxu1 }
 0x370   :  { %v4493_v25 = vadd.f32 %v4492_v21, %v4491_v42  ;;  %3900 = vmax.xlane.f32.xlu0 %v3894_v56 }
 0x372   :  { %v3897_v28 = vadd.f32 %v4493_v25, %v3856_v22 }
 0x374   :  { %3902 = vmax.xlane.f32.xlu0 %v3897_v28 }
 0x3f9   :  { %v3901_v60 = vpop.xlane.xlu0 %3900 }
 0x3fa   :  { %v3904_v31 = vsub.f32 %v3894_v56, %v3901_v60 }
 0x3fc   :  { %v3906_v33 = vmul.f32 1.442695, %v3904_v31 }
 0x3fd   :  { %v3903_v34 = vpop.xlane.xlu0 %3902 }
 0x3fe   :  { %4573 = vpow2.f32 %v3906_v33  ;;  %v3905_v35 = vsub.f32 %v3897_v28, %v3903_v34 }
 0x400   :  { %v3908_v37 = vmul.f32 1.442695, %v3905_v35 }
 0x402   :  { %4575 = vpow2.f32 %v3908_v37 }
 0x40b   :  { %v4574_v38 = vpop.eup %4573 }
 0x40c   :  { %3910 = vadd.xlane.f32.xlu1 %v4574_v38 }
 0x40f   :  { %v4576_v36 = vpop.eup %4575 }
 0x410   :  { %3912 = vadd.xlane.f32.xlu1 %v4576_v36 }
 0x495   :  { %v3911_v39 = vpop.xlane.xlu1 %3910 }
 0x496   :  { %4577 = vrcp.f32 %v3911_v39 }
 0x499   :  { %v3913_v30 = vpop.xlane.xlu1 %3912 }
 0x49a   :  { %4579 = vrcp.f32 %v3913_v30 }
 0x4a3   :  { %v4578_v48 = vpop.eup %4577 }
 0x4a4   :  { %v3916_v29 = vmul.f32 %v4578_v48, %v3911_v39 }
 0x4a6   :  { %v3918_v50 = vsub.f32 2.0, %v3916_v29 }
 0x4a7   :  { %v4580_v3 = vpop.eup %4579 }
 0x4a8   :  { %v3920_v53 = vmul.f32 %v4578_v48, %v3918_v50  ;;  %v3917_v54 = vmul.f32 %v4580_v3, %v3913_v30 }
 0x4aa   :  { %v3922_v46 = vmul.f32 %v4574_v38, %v3920_v53  ;;  %v3919_v44 = vsub.f32 2.0, %v3917_v54 }
 0x4ac   :  { %3924 = vst [vmem:[#allocation11] sm:$0xff] %v3922_v46  ;;  %v3921_v51 = vmul.f32 %v4580_v3, %v3919_v44 }
 0x4ae   :  { %v3923_v55 = vmul.f32 %v4576_v36, %v3921_v51 }
 0x4b0   :  { %3925 = vst [vmem:[#allocation11 + $0x8] sm:$0xff] %v3923_v55 }
 0x4b1   :  { %4692 = shalt.err (!%p4689_p1)
}
 0x4b2   :  { %s4722_s23 = smov 128   ;;  %s4723_s24 = smov 8  }
 0x4b3   :  { %3937 = dma.vmem_to_hbm [thread:$0]  %s3932_s4, 256, %s4913_s5, [#allocation4], %s4722_s23, %s4722_s23, %s4723_s24  }
 0x4b4   :  { %4707 = dma.done.wait [#allocation4], 256  }
 0x4b5   :  { %4708 = vsyncadd [#allocation4], 4294967040 }
 0x4b6   :  { %3941 = vsyncpa [#allocation3], 1 }
 0x4b7   :  { %3942 = vsyncpa [#allocation6], 1 }
 0x4b8   :  { %3943 = vsyncpa [#allocation9], 1 }
 0x4b9   :  { %3944 = vsyncpa [#allocation4], 1 }

</bundles_post_ra>
